<compile_context>
chip_gen: v7x
topology: tpu7x:2x2x1
jax: 0.10.0
libtpu: 0.0.40
codegen_flags: <defaults>
</compile_context>

<pallas_src>
import functools
import math

import jax
import jax.numpy as jnp
import numpy as np
from jax.experimental import pallas as pl
from jax.experimental.pallas import tpu as pltpu


# --------------------------------------------------------------------------- #
# Kernel A: LayerNorm + modulation -> linear1 (qkv panel) -> QKNorm -> RoPE
# --------------------------------------------------------------------------- #
def qkv_kernel(x_ref, sm_ref, ra_ref, rb_ref, w1q_ref, b1q_ref, qs_ref, ks_ref,
               q_ref, k_ref, v_ref):
    f32 = jnp.float32
    H = x_ref.shape[-1]
    G = q_ref.shape[1]           # heads produced per grid step
    D = q_ref.shape[-1]
    D2 = D // 2

    x = x_ref[0].astype(f32)                       # (TL, H) (bf16 in, f32 stats)
    sm = sm_ref[0]                                 # (1, 2H): [1+scale | shift]
    scale1, shift = sm[:, :H], sm[:, H:]

    mu = jnp.mean(x, axis=-1, keepdims=True)
    var = jnp.mean((x - mu) ** 2, axis=-1, keepdims=True)
    x_mod = scale1 * ((x - mu) * jax.lax.rsqrt(var + 1e-6)) + shift

    # bf16 operands on the MXU, f32 accumulation.
    y = jnp.dot(x_mod.astype(jnp.bfloat16), w1q_ref[...],
                preferred_element_type=f32) + b1q_ref[...]          # (TL, 3*D*G)

    ra = ra_ref[...]                               # (TL, D) deinterleaved layout
    rb = rb_ref[...]
    rae, rao = ra[:, :D2], ra[:, D2:]
    rbe, rbo = rb[:, :D2], rb[:, D2:]
    qs = qs_ref[...]
    ks = ks_ref[...]
    inv_sqrt_d = 1.0 / math.sqrt(D)

    def rope(t):
        # head dim is deinterleaved ([even | odd]) -> the pair swap is a
        # half-split elementwise combine, no matmul / MXU involvement.
        te, to = t[:, :D2], t[:, D2:]
        return jnp.concatenate([rae * te + rbe * to, rao * to + rbo * te], axis=-1)

    for g in range(G):
        base = 3 * D * g
        q = y[:, base:base + D]
        k = y[:, base + D:base + 2 * D]
        v = y[:, base + 2 * D:base + 3 * D]
        # QKNorm = RMSNorm(head_dim) with learnable scale, eps = 1e-6 (f32 stats)
        q = q * jax.lax.rsqrt(jnp.mean(q * q, -1, keepdims=True) + 1e-6) * qs
        k = k * jax.lax.rsqrt(jnp.mean(k * k, -1, keepdims=True) + 1e-6) * ks
        q_ref[0, g] = (rope(q) * inv_sqrt_d).astype(q_ref.dtype)   # fold 1/sqrt(D)
        k_ref[0, g] = rope(k).astype(k_ref.dtype)
        v_ref[0, g] = v.astype(v_ref.dtype)


# --------------------------------------------------------------------------- #
# Kernel B: MLP branch, mlp-hidden dim streamed in panels (reduction axis)
# --------------------------------------------------------------------------- #
def mlp_kernel(x_ref, sm_ref, w1m_ref, b1m_ref, w2b_ref, out_ref,
               xmod_scr, acc_scr):
    f32 = jnp.float32
    H = x_ref.shape[-1]
    m = pl.program_id(2)

    @pl.when(m == 0)
    def _():
        x = x_ref[0].astype(f32)
        sm = sm_ref[0]
        scale1, shift = sm[:, :H], sm[:, H:]
        mu = jnp.mean(x, axis=-1, keepdims=True)
        var = jnp.mean((x - mu) ** 2, axis=-1, keepdims=True)
        x_mod = scale1 * ((x - mu) * jax.lax.rsqrt(var + 1e-6)) + shift
        xmod_scr[...] = x_mod.astype(xmod_scr.dtype)
        acc_scr[...] = jnp.zeros(acc_scr.shape, acc_scr.dtype)

    h_panel = jnp.dot(xmod_scr[...], w1m_ref[...],
                      preferred_element_type=f32) + b1m_ref[...]     # (TL, TM)
    act = jax.nn.gelu(h_panel, approximate=True)                     # GELU(tanh)
    acc_scr[...] += jnp.dot(act.astype(jnp.bfloat16), w2b_ref[...],
                            preferred_element_type=f32)              # (TL, H)

    @pl.when(m == pl.num_programs(2) - 1)
    def _():
        out_ref[0] = acc_scr[...].astype(out_ref.dtype)


# --------------------------------------------------------------------------- #
# Kernel C: flash attention over KV tiles + fused linear2 + gated residual
# --------------------------------------------------------------------------- #
def attn_combine_kernel(q_ref, k_ref, v_ref, mlp_ref, x_ref, gate_ref,
                        w2a_ref, b2_ref, out_ref, m_scr, l_scr, acc_scr):
    f32 = jnp.float32
    bf16 = jnp.bfloat16
    NH = q_ref.shape[1]
    j = pl.program_id(2)

    @pl.when(j == 0)
    def _():
        m_scr[...] = jnp.full(m_scr.shape, -jnp.inf, m_scr.dtype)
        l_scr[...] = jnp.zeros(l_scr.shape, l_scr.dtype)
        acc_scr[...] = jnp.zeros(acc_scr.shape, acc_scr.dtype)

    q = q_ref[0]                                   # (NH, TQ, D) bf16, pre-scaled
    k = k_ref[0]                                   # (NH, TK, D) bf16
    v = v_ref[0]                                   # (NH, TK, D) bf16

    s = jnp.einsum('hqd,hkd->hqk', q, k, preferred_element_type=f32)
    m_prev = m_scr[...]
    m_new = jnp.maximum(m_prev, jnp.max(s, axis=-1, keepdims=True))
    alpha = jnp.exp(m_prev - m_new)                # tiny (NH,TQ,1): keep f32
    # One exp per score element on a single EUP: do it in bf16 (p feeds a bf16
    # matmul anyway); accumulation of l / acc stays f32.
    p = jnp.exp((s - m_new).astype(bf16))
    l_scr[...] = alpha * l_scr[...] + jnp.sum(p.astype(f32), axis=-1, keepdims=True)
    acc_scr[...] = alpha * acc_scr[...] + jnp.einsum(
        'hqk,hkd->hqd', p, v, preferred_element_type=f32)
    m_scr[...] = m_new

    @pl.when(j == pl.num_programs(2) - 1)
    def _():
        # Normalize, lane-concatenate heads -> (TQ, H), then a single full-depth
        # (TQ,H)@(H,H) projection matmul (instead of NH separate K=D matmuls).
        o = (acc_scr[...] * pl.reciprocal(l_scr[...], approx=False)).astype(bf16)
        o_cat = jnp.concatenate([o[h] for h in range(NH)], axis=-1)   # (TQ, H)
        proj = jnp.dot(o_cat, w2a_ref[...], preferred_element_type=f32)
        res = mlp_ref[0].astype(f32) + b2_ref[...] + proj
        out_ref[0] = (x_ref[0].astype(f32) + gate_ref[0] * res).astype(out_ref.dtype)


# --------------------------------------------------------------------------- #
# Wrapper
# --------------------------------------------------------------------------- #
def _pick_tile(n, target, align):
    """Largest divisor of n that is <= target and a multiple of `align`."""
    if n <= target:
        return n
    for t in range(target, 0, -1):
        if n % t == 0 and t % align == 0:
            return t
    return n


def single_stream_block(x, vec, pe, params, num_heads, *,
                        qkv_seq_tile=256,        # kernel A sequence tile
                        mlp_seq_tile=512,        # kernel B sequence tile (v6e: up to 1024)
                        mlp_tile=1024,           # kernel B hidden-dim panel
                        attn_q_tile=512,         # kernel C query tile (v7x: 384)
                        attn_kv_tile=256,        # kernel C kv tile
                        head_tile=8,             # kernel A heads per step (v7x: 4)
                        vmem_limit_bytes=112 * 1024 * 1024):  # v7x: ~52 MiB
    f32 = jnp.float32
    bf16 = jnp.bfloat16

    B, L, H = x.shape
    NH = num_heads
    D = H // NH
    M = params['w2'].shape[1] - H

    # ---- modulation hoisted out of the kernel (tiny vector-matrix product) ---
    vs = vec.astype(f32) * jax.nn.sigmoid(vec.astype(f32))
    modv = vs @ params['wm'].T.astype(f32) + params['bm'].astype(f32)  # (B, 3H)
    shift, scale, gate = jnp.split(modv, 3, axis=-1)
    sm = jnp.concatenate([1.0 + scale, shift], axis=-1)[:, None, :]    # (B,1,2H)
    gate3 = gate[:, None, :].astype(f32)                               # (B,1,H)

    # x is read by kernels A and B only for LayerNorm input: bf16 halves traffic
    # (statistics are still computed in f32 inside the kernels).  The residual
    # read in kernel C keeps the original dtype.
    x_bf = x.astype(bf16)

    # ---- RoPE coefficients in deinterleaved ([even | odd]) head layout -------
    p = pe[0, 0].astype(f32)                                           # (L, D/2, 2, 2)
    ra = jnp.concatenate([p[..., 0, 0], p[..., 1, 1]], axis=-1)        # (L, D)
    rb = jnp.concatenate([p[..., 0, 1], p[..., 1, 0]], axis=-1)        # (L, D)

    # ---- weight preparation: bf16, deinterleaved q/k, per-head qkv grouping --
    perm_head = np.concatenate([np.arange(0, D, 2), np.arange(1, D, 2)])
    col_order = np.concatenate([
        np.concatenate([h * D + perm_head,                 # q cols (deinterleaved)
                        H + h * D + perm_head,             # k cols (deinterleaved)
                        2 * H + h * D + np.arange(D)])     # v cols (original)
        for h in range(NH)])                               # (3H,)

    w1q_t = params['w1'][:3 * H][col_order].T.astype(bf16)             # (H, 3H)
    b1q = params['b1'][:3 * H][col_order].reshape(1, 3 * H).astype(f32)
    w1m_t = params['w1'][3 * H:].T.astype(bf16)                        # (H, M)
    b1m = params['b1'][3 * H:].reshape(1, M).astype(f32)
    w2a_t = params['w2'][:, :H].T.astype(bf16)                         # (H, H)
    w2b_t = params['w2'][:, H:].T.astype(bf16)                         # (M, H)
    b2 = params['b2'].reshape(1, H).astype(f32)
    qs = params['qs'][perm_head].reshape(1, D).astype(f32)
    ks = params['ks'][perm_head].reshape(1, D).astype(f32)

    # ---- tiling (decoupled per kernel) ---------------------------------------
    TLA = _pick_tile(L, qkv_seq_tile, 8)       # kernel A sequence tile
    TLB = _pick_tile(L, mlp_seq_tile, 8)       # kernel B sequence tile
    TQ = _pick_tile(L, attn_q_tile, 8)         # kernel C query tile
    TK = _pick_tile(L, attn_kv_tile, 8)        # kernel C kv tile
    TM = _pick_tile(M, mlp_tile, 128)          # mlp hidden panel
    G = _pick_tile(NH, head_tile, 1)           # heads per qkv grid step
    NLA, NLB, NQT, NKV = L // TLA, L // TLB, L // TQ, L // TK
    NMP, NHG = M // TM, NH // G

    # ---------------- Kernel A: QKV + QKNorm + RoPE ---------------------------
    # Grid order (B, head-group, L-tile): L-tile innermost so the qkv weight
    # panel stays resident across all L tiles (only x is re-read per head group).
    q_arr, k_arr, v_arr = pl.pallas_call(
        qkv_kernel,
        out_shape=(jax.ShapeDtypeStruct((B, NH, L, D), bf16),
                   jax.ShapeDtypeStruct((B, NH, L, D), bf16),
                   jax.ShapeDtypeStruct((B, NH, L, D), bf16)),
        grid_spec=pltpu.PrefetchScalarGridSpec(
            num_scalar_prefetch=0,
            grid=(B, NHG, NLA),
            in_specs=[
                pl.BlockSpec((1, TLA, H), lambda b, g, i: (b, i, 0)),      # x (bf16)
                pl.BlockSpec((1, 1, 2 * H), lambda b, g, i: (b, 0, 0)),    # [1+scale|shift]
                pl.BlockSpec((TLA, D), lambda b, g, i: (i, 0)),            # rope A
                pl.BlockSpec((TLA, D), lambda b, g, i: (i, 0)),            # rope B
                pl.BlockSpec((H, 3 * D * G), lambda b, g, i: (0, g)),      # w1 qkv panel
                pl.BlockSpec((1, 3 * D * G), lambda b, g, i: (0, g)),      # b1 qkv panel
                pl.BlockSpec((1, D), lambda b, g, i: (0, 0)),              # qs (permuted)
                pl.BlockSpec((1, D), lambda b, g, i: (0, 0)),              # ks (permuted)
            ],
            out_specs=(
                pl.BlockSpec((1, G, TLA, D), lambda b, g, i: (b, g, i, 0)),
                pl.BlockSpec((1, G, TLA, D), lambda b, g, i: (b, g, i, 0)),
                pl.BlockSpec((1, G, TLA, D), lambda b, g, i: (b, g, i, 0)),
            ),
        ),
        compiler_params=pltpu.CompilerParams(
            dimension_semantics=("parallel", "parallel", "parallel"),
            vmem_limit_bytes=vmem_limit_bytes),
    )(x_bf, sm, ra, rb, w1q_t, b1q, qs, ks)

    # ---------------- Kernel B: MLP branch (panel-streamed) --------------------
    mlp_branch = pl.pallas_call(
        mlp_kernel,
        out_shape=jax.ShapeDtypeStruct((B, L, H), bf16),
        grid_spec=pltpu.PrefetchScalarGridSpec(
            num_scalar_prefetch=0,
            grid=(B, NLB, NMP),
            in_specs=[
                pl.BlockSpec((1, TLB, H), lambda b, i, m: (b, i, 0)),      # x (bf16)
                pl.BlockSpec((1, 1, 2 * H), lambda b, i, m: (b, 0, 0)),    # [1+scale|shift]
                pl.BlockSpec((H, TM), lambda b, i, m: (0, m)),             # w1 mlp panel
                pl.BlockSpec((1, TM), lambda b, i, m: (0, m)),             # b1 mlp panel
                pl.BlockSpec((TM, H), lambda b, i, m: (m, 0)),             # w2 mlp panel
            ],
            out_specs=pl.BlockSpec((1, TLB, H), lambda b, i, m: (b, i, 0)),
            scratch_shapes=[pltpu.VMEM((TLB, H), bf16),          # x_mod stash
                            pltpu.VMEM((TLB, H), jnp.float32)],  # accumulator
        ),
        compiler_params=pltpu.CompilerParams(
            dimension_semantics=("parallel", "parallel", "arbitrary"),
            vmem_limit_bytes=vmem_limit_bytes),
    )(x_bf, sm, w1m_t, b1m, w2b_t)

    # ---------------- Kernel C: flash attention + linear2 + residual -----------
    out = pl.pallas_call(
        attn_combine_kernel,
        out_shape=jax.ShapeDtypeStruct((B, L, H), x.dtype),
        grid_spec=pltpu.PrefetchScalarGridSpec(
            num_scalar_prefetch=0,
            grid=(B, NQT, NKV),
            in_specs=[
                pl.BlockSpec((1, NH, TQ, D), lambda b, i, j: (b, 0, i, 0)),  # q
                pl.BlockSpec((1, NH, TK, D), lambda b, i, j: (b, 0, j, 0)),  # k
                pl.BlockSpec((1, NH, TK, D), lambda b, i, j: (b, 0, j, 0)),  # v
                pl.BlockSpec((1, TQ, H), lambda b, i, j: (b, i, 0)),         # mlp branch
                pl.BlockSpec((1, TQ, H), lambda b, i, j: (b, i, 0)),         # x residual
                pl.BlockSpec((1, 1, H), lambda b, i, j: (b, 0, 0)),          # gate
                pl.BlockSpec((H, H), lambda b, i, j: (0, 0)),                # w2 attn part
                pl.BlockSpec((1, H), lambda b, i, j: (0, 0)),                # b2
            ],
            out_specs=pl.BlockSpec((1, TQ, H), lambda b, i, j: (b, i, 0)),
            scratch_shapes=[
                pltpu.VMEM((NH, TQ, 1), jnp.float32),   # running max
                pltpu.VMEM((NH, TQ, 1), jnp.float32),   # running sum
                pltpu.VMEM((NH, TQ, D), jnp.float32),   # output accumulator
            ],
        ),
        compiler_params=pltpu.CompilerParams(
            dimension_semantics=("parallel", "parallel", "arbitrary"),
            vmem_limit_bytes=vmem_limit_bytes),
    )(q_arr, k_arr, v_arr, mlp_branch, x, gate3, w2a_t, b2)

    return out


# --------------------------------------------------------------------------- #
# Pure-JAX reference (mirrors the PyTorch forward exactly)
# --------------------------------------------------------------------------- #
def reference(x, vec, pe, params, num_heads):
    B, L, H = x.shape
    D = H // num_heads

    vs = vec * jax.nn.sigmoid(vec)
    modv = vs @ params['wm'].T + params['bm']
    shift, scale, gate = jnp.split(modv[:, None, :], 3, axis=-1)

    mu = x.mean(-1, keepdims=True)
    var = ((x - mu) ** 2).mean(-1, keepdims=True)
    xn = (x - mu) / jnp.sqrt(var + 1e-6)
    x_mod = (1.0 + scale) * xn + shift

    y = x_mod @ params['w1'].T + params['b1']
    qkv, mlp = y[..., :3 * H], y[..., 3 * H:]
    qkv = qkv.reshape(B, L, 3, num_heads, D).transpose(2, 0, 3, 1, 4)   # K B Hh L D
    q, k, v = qkv[0], qkv[1], qkv[2]

    def rms(t, s):
        return t * jax.lax.rsqrt(jnp.mean(t * t, -1, keepdims=True) + 1e-6) * s

    q = rms(q, params['qs'])
    k = rms(k, params['ks'])

    def apply_rope(t):
        t_ = t.reshape(*t.shape[:-1], -1, 1, 2)
        out = pe[..., 0] * t_[..., 0] + pe[..., 1] * t_[..., 1]
        return out.reshape(*t.shape)

    q = apply_rope(q)
    k = apply_rope(k)

    s = jnp.einsum('bhld,bhmd->bhlm', q, k) / math.sqrt(D)
    pr = jax.nn.softmax(s, axis=-1)
    o = jnp.einsum('bhlm,bhmd->bhld', pr, v)
    attn = o.transpose(0, 2, 1, 3).reshape(B, L, H)

    act = jax.nn.gelu(mlp, approximate=True)
    out = jnp.concatenate([attn, act], axis=-1) @ params['w2'].T + params['b2']
    return x + gate * out


def make_pe(L, D):
    i = np.arange(D // 2)
    freqs = 1.0 / (10000.0 ** (2 * i / D))
    ang = np.arange(L)[:, None] * freqs[None, :]
    cos, sin = np.cos(ang), np.sin(ang)
    pe = np.stack([np.stack([cos, -sin], -1), np.stack([sin, cos], -1)], axis=-2)
    return jnp.asarray(pe[None, None], dtype=jnp.float32)       # (1,1,L,D//2,2,2)


# --------------------------------------------------------------------------- #
if __name__ == "__main__":
    B, L, H, NH = 2, 16, 32, 4
    D = H // NH
    M = 256   # mlp hidden (ratio 8) so the mlp reduction axis has >1 panel

    key = jax.random.PRNGKey(0)
    keys = jax.random.split(key, 10)

    x = jax.random.normal(keys[0], (B, L, H), jnp.float32)
    vec = jax.random.normal(keys[1], (B, H), jnp.float32)
    pe = make_pe(L, D)

    params = {
        'wm': jax.random.normal(keys[2], (3 * H, H), jnp.float32) * 0.02,
        'bm': jax.random.normal(keys[3], (3 * H,), jnp.float32) * 0.02,
        'w1': jax.random.normal(keys[4], (3 * H + M, H), jnp.float32) * 0.02,
        'b1': jax.random.normal(keys[5], (3 * H + M,), jnp.float32) * 0.02,
        'w2': jax.random.normal(keys[6], (H, H + M), jnp.float32) * 0.02,
        'b2': jax.random.normal(keys[7], (H,), jnp.float32) * 0.02,
        'qs': 1.0 + 0.1 * jax.random.normal(keys[8], (D,), jnp.float32),
        'ks': 1.0 + 0.1 * jax.random.normal(keys[9], (D,), jnp.float32),
    }

    # Small tiles force multiple L-tiles, KV-tiles and mlp panels so every
    # pipelined accumulation path and index map is exercised at test size.
    out = single_stream_block(x, vec, pe, params, NH,
                              qkv_seq_tile=8, mlp_seq_tile=8, mlp_tile=128,
                              attn_q_tile=8, attn_kv_tile=8)
    out = jax.block_until_ready(out)

    ref = reference(x, vec, pe, params, NH)
    np.testing.assert_allclose(np.asarray(out), np.asarray(ref), rtol=2e-2, atol=2e-2)
    print("KERNEL_OK")
</pallas_src>

<mosaic_0001>
module attributes {stable_mosaic.version = 11 : i64} {
  func.func @qkv_kernel(%arg0: i32, %arg1: i32, %arg2: i32, %arg3: memref<1x8x32xbf16, #tpu.memory_space<vmem>>, %arg4: memref<1x1x64xf32, #tpu.memory_space<vmem>>, %arg5: memref<8x8xf32, #tpu.memory_space<vmem>>, %arg6: memref<8x8xf32, #tpu.memory_space<vmem>>, %arg7: memref<32x96xbf16, #tpu.memory_space<vmem>>, %arg8: memref<1x96xf32, #tpu.memory_space<vmem>>, %arg9: memref<1x8xf32, #tpu.memory_space<vmem>>, %arg10: memref<1x8xf32, #tpu.memory_space<vmem>>, %arg11: memref<1x4x8x8xbf16, #tpu.memory_space<vmem>>, %arg12: memref<1x4x8x8xbf16, #tpu.memory_space<vmem>>, %arg13: memref<1x4x8x8xbf16, #tpu.memory_space<vmem>>) attributes {dimension_semantics = [#tpu.dimension_semantics<parallel>, #tpu.dimension_semantics<parallel>, #tpu.dimension_semantics<parallel>], iteration_bounds = array<i64: 2, 1, 2>, scalar_prefetch = 0 : i64, scratch_operands = 0 : i64, tpu.core_type = #tpu.core_type<tc>, window_params = [{transform_indices = @transform_0, window_bounds = array<i64: 1, 8, 32>}, {transform_indices = @transform_1, window_bounds = array<i64: 1, 1, 64>}, {transform_indices = @transform_2, window_bounds = array<i64: 8, 8>}, {transform_indices = @transform_3, window_bounds = array<i64: 8, 8>}, {transform_indices = @transform_4, window_bounds = array<i64: 32, 96>}, {transform_indices = @transform_5, window_bounds = array<i64: 1, 96>}, {pipeline_mode = #tpu.pipeline_mode<synchronous>, transform_indices = @transform_6, window_bounds = array<i64: 1, 8>}, {pipeline_mode = #tpu.pipeline_mode<synchronous>, transform_indices = @transform_7, window_bounds = array<i64: 1, 8>}, {transform_indices = @transform_8, window_bounds = array<i64: 1, 4, 8, 8>}, {transform_indices = @transform_9, window_bounds = array<i64: 1, 4, 8, 8>}, {transform_indices = @transform_10, window_bounds = array<i64: 1, 4, 8, 8>}]} {
    %c0 = arith.constant 0 : index
    %c0_0 = arith.constant 0 : index
    %c0_1 = arith.constant 0 : index
    %0 = vector.load %arg3[%c0, %c0_0, %c0_1] : memref<1x8x32xbf16, #tpu.memory_space<vmem>>, vector<1x8x32xbf16>
    %1 = vector.shape_cast %0 : vector<1x8x32xbf16> to vector<8x32xbf16>
    %2 = arith.extf %1 : vector<8x32xbf16> to vector<8x32xf32>
    %c0_2 = arith.constant 0 : index
    %c0_3 = arith.constant 0 : index
    %c0_4 = arith.constant 0 : index
    %3 = vector.load %arg4[%c0_2, %c0_3, %c0_4] : memref<1x1x64xf32, #tpu.memory_space<vmem>>, vector<1x1x64xf32>
    %4 = vector.shape_cast %3 : vector<1x1x64xf32> to vector<1x64xf32>
    %5 = vector.extract_strided_slice %4 {offsets = [0, 0], sizes = [1, 32], strides = [1, 1]} : vector<1x64xf32> to vector<1x32xf32>
    %6 = vector.extract_strided_slice %4 {offsets = [0, 32], sizes = [1, 32], strides = [1, 1]} : vector<1x64xf32> to vector<1x32xf32>
    %cst = arith.constant dense<0.000000e+00> : vector<8xf32>
    %7 = vector.multi_reduction <add>, %2, %cst [1] : vector<8x32xf32> to vector<8xf32>
    %8 = vector.shape_cast %7 : vector<8xf32> to vector<8x1xf32>
    %cst_5 = arith.constant 3.200000e+01 : f32
    %9 = vector.broadcast %cst_5 : f32 to vector<8x1xf32>
    %10 = arith.divf %8, %9 : vector<8x1xf32>
    %11 = vector.broadcast %10 : vector<8x1xf32> to vector<8x32xf32>
    %12 = arith.subf %2, %11 : vector<8x32xf32>
    %13 = arith.mulf %12, %12 : vector<8x32xf32>
    %cst_6 = arith.constant dense<0.000000e+00> : vector<8xf32>
    %14 = vector.multi_reduction <add>, %13, %cst_6 [1] : vector<8x32xf32> to vector<8xf32>
    %15 = vector.shape_cast %14 : vector<8xf32> to vector<8x1xf32>
    %cst_7 = arith.constant 3.200000e+01 : f32
    %16 = vector.broadcast %cst_7 : f32 to vector<8x1xf32>
    %17 = arith.divf %15, %16 : vector<8x1xf32>
    %18 = vector.broadcast %10 : vector<8x1xf32> to vector<8x32xf32>
    %19 = arith.subf %2, %18 : vector<8x32xf32>
    %cst_8 = arith.constant 9.99999997E-7 : f32
    %20 = vector.broadcast %cst_8 : f32 to vector<8x1xf32>
    %21 = arith.addf %17, %20 : vector<8x1xf32>
    %22 = math.rsqrt %21 : vector<8x1xf32>
    %23 = vector.broadcast %22 : vector<8x1xf32> to vector<8x32xf32>
    %24 = arith.mulf %19, %23 : vector<8x32xf32>
    %25 = vector.broadcast %5 : vector<1x32xf32> to vector<8x32xf32>
    %26 = arith.mulf %25, %24 : vector<8x32xf32>
    %27 = vector.broadcast %6 : vector<1x32xf32> to vector<8x32xf32>
    %28 = arith.addf %26, %27 : vector<8x32xf32>
    %29 = arith.truncf %28 : vector<8x32xf32> to vector<8x32xbf16>
    %c0_9 = arith.constant 0 : index
    %c0_10 = arith.constant 0 : index
    %30 = vector.load %arg7[%c0_9, %c0_10] : memref<32x96xbf16, #tpu.memory_space<vmem>>, vector<32x96xbf16>
    %cst_11 = arith.constant dense<0.000000e+00> : vector<8x96xf32>
    %31 = tpu.matmul %29, %30, %cst_11 {dimension_numbers = #tpu.dot_dimension_numbers<[1], [0], [0], [1], [0, 0, 1, 1], [], []>} : vector<8x32xbf16>, vector<32x96xbf16>, vector<8x96xf32> -> vector<8x96xf32>
    %c0_12 = arith.constant 0 : index
    %c0_13 = arith.constant 0 : index
    %32 = vector.load %arg8[%c0_12, %c0_13] : memref<1x96xf32, #tpu.memory_space<vmem>>, vector<1x96xf32>
    %33 = vector.broadcast %32 : vector<1x96xf32> to vector<8x96xf32>
    %34 = arith.addf %31, %33 : vector<8x96xf32>
    %c0_14 = arith.constant 0 : index
    %c0_15 = arith.constant 0 : index
    %35 = vector.load %arg5[%c0_14, %c0_15] : memref<8x8xf32, #tpu.memory_space<vmem>>, vector<8x8xf32>
    %c0_16 = arith.constant 0 : index
    %c0_17 = arith.constant 0 : index
    %36 = vector.load %arg6[%c0_16, %c0_17] : memref<8x8xf32, #tpu.memory_space<vmem>>, vector<8x8xf32>
    %37 = vector.extract_strided_slice %35 {offsets = [0, 0], sizes = [8, 4], strides = [1, 1]} : vector<8x8xf32> to vector<8x4xf32>
    %38 = vector.extract_strided_slice %35 {offsets = [0, 4], sizes = [8, 4], strides = [1, 1]} : vector<8x8xf32> to vector<8x4xf32>
    %39 = vector.extract_strided_slice %36 {offsets = [0, 0], sizes = [8, 4], strides = [1, 1]} : vector<8x8xf32> to vector<8x4xf32>
    %40 = vector.extract_strided_slice %36 {offsets = [0, 4], sizes = [8, 4], strides = [1, 1]} : vector<8x8xf32> to vector<8x4xf32>
    %c0_18 = arith.constant 0 : index
    %c0_19 = arith.constant 0 : index
    %41 = vector.load %arg9[%c0_18, %c0_19] : memref<1x8xf32, #tpu.memory_space<vmem>>, vector<1x8xf32>
    %c0_20 = arith.constant 0 : index
    %c0_21 = arith.constant 0 : index
    %42 = vector.load %arg10[%c0_20, %c0_21] : memref<1x8xf32, #tpu.memory_space<vmem>>, vector<1x8xf32>
    %43 = vector.extract_strided_slice %34 {offsets = [0, 0], sizes = [8, 8], strides = [1, 1]} : vector<8x96xf32> to vector<8x8xf32>
    %44 = vector.extract_strided_slice %34 {offsets = [0, 8], sizes = [8, 8], strides = [1, 1]} : vector<8x96xf32> to vector<8x8xf32>
    %45 = vector.extract_strided_slice %34 {offsets = [0, 16], sizes = [8, 8], strides = [1, 1]} : vector<8x96xf32> to vector<8x8xf32>
    %46 = arith.mulf %43, %43 : vector<8x8xf32>
    %cst_22 = arith.constant dense<0.000000e+00> : vector<8xf32>
    %47 = vector.multi_reduction <add>, %46, %cst_22 [1] : vector<8x8xf32> to vector<8xf32>
    %48 = vector.shape_cast %47 : vector<8xf32> to vector<8x1xf32>
    %cst_23 = arith.constant 8.000000e+00 : f32
    %49 = vector.broadcast %cst_23 : f32 to vector<8x1xf32>
    %50 = arith.divf %48, %49 : vector<8x1xf32>
    %cst_24 = arith.constant 9.99999997E-7 : f32
    %51 = vector.broadcast %cst_24 : f32 to vector<8x1xf32>
    %52 = arith.addf %50, %51 : vector<8x1xf32>
    %53 = math.rsqrt %52 : vector<8x1xf32>
    %54 = vector.broadcast %53 : vector<8x1xf32> to vector<8x8xf32>
    %55 = arith.mulf %43, %54 : vector<8x8xf32>
    %56 = vector.broadcast %41 : vector<1x8xf32> to vector<8x8xf32>
    %57 = arith.mulf %55, %56 : vector<8x8xf32>
    %58 = arith.mulf %44, %44 : vector<8x8xf32>
    %cst_25 = arith.constant dense<0.000000e+00> : vector<8xf32>
    %59 = vector.multi_reduction <add>, %58, %cst_25 [1] : vector<8x8xf32> to vector<8xf32>
    %60 = vector.shape_cast %59 : vector<8xf32> to vector<8x1xf32>
    %cst_26 = arith.constant 8.000000e+00 : f32
    %61 = vector.broadcast %cst_26 : f32 to vector<8x1xf32>
    %62 = arith.divf %60, %61 : vector<8x1xf32>
    %cst_27 = arith.constant 9.99999997E-7 : f32
    %63 = vector.broadcast %cst_27 : f32 to vector<8x1xf32>
    %64 = arith.addf %62, %63 : vector<8x1xf32>
    %65 = math.rsqrt %64 : vector<8x1xf32>
    %66 = vector.broadcast %65 : vector<8x1xf32> to vector<8x8xf32>
    %67 = arith.mulf %44, %66 : vector<8x8xf32>
    %68 = vector.broadcast %42 : vector<1x8xf32> to vector<8x8xf32>
    %69 = arith.mulf %67, %68 : vector<8x8xf32>
    %70 = vector.extract_strided_slice %57 {offsets = [0, 0], sizes = [8, 4], strides = [1, 1]} : vector<8x8xf32> to vector<8x4xf32>
    %71 = vector.extract_strided_slice %57 {offsets = [0, 4], sizes = [8, 4], strides = [1, 1]} : vector<8x8xf32> to vector<8x4xf32>
    %72 = arith.mulf %37, %70 : vector<8x4xf32>
    %73 = arith.mulf %39, %71 : vector<8x4xf32>
    %74 = arith.addf %72, %73 : vector<8x4xf32>
    %75 = arith.mulf %38, %71 : vector<8x4xf32>
    %76 = arith.mulf %40, %70 : vector<8x4xf32>
    %77 = arith.addf %75, %76 : vector<8x4xf32>
    %78 = tpu.concatenate %74, %77 in 1 : vector<8x4xf32>, vector<8x4xf32> -> vector<8x8xf32>
    %cst_28 = arith.constant 0.353553385 : f32
    %79 = vector.broadcast %cst_28 : f32 to vector<8x8xf32>
    %80 = arith.mulf %78, %79 : vector<8x8xf32>
    %81 = arith.truncf %80 : vector<8x8xf32> to vector<8x8xbf16>
    %c0_29 = arith.constant 0 : index
    %c0_30 = arith.constant 0 : index
    %c0_31 = arith.constant 0 : index
    %c0_32 = arith.constant 0 : index
    %82 = vector.load %arg11[%c0_29, %c0_30, %c0_31, %c0_32] : memref<1x4x8x8xbf16, #tpu.memory_space<vmem>>, vector<1x1x8x8xbf16>
    %83 = vector.shape_cast %82 : vector<1x1x8x8xbf16> to vector<8x8xbf16>
    %84 = vector.shape_cast %81 : vector<8x8xbf16> to vector<1x1x8x8xbf16>
    tpu.vector_store %arg11[%c0_29, %c0_30, %c0_31, %c0_32], %84 {strides = array<i32>} : memref<1x4x8x8xbf16, #tpu.memory_space<vmem>>, vector<1x1x8x8xbf16>,
    %85 = vector.extract_strided_slice %69 {offsets = [0, 0], sizes = [8, 4], strides = [1, 1]} : vector<8x8xf32> to vector<8x4xf32>
    %86 = vector.extract_strided_slice %69 {offsets = [0, 4], sizes = [8, 4], strides = [1, 1]} : vector<8x8xf32> to vector<8x4xf32>
    %87 = arith.mulf %37, %85 : vector<8x4xf32>
    %88 = arith.mulf %39, %86 : vector<8x4xf32>
    %89 = arith.addf %87, %88 : vector<8x4xf32>
    %90 = arith.mulf %38, %86 : vector<8x4xf32>
    %91 = arith.mulf %40, %85 : vector<8x4xf32>
    %92 = arith.addf %90, %91 : vector<8x4xf32>
    %93 = tpu.concatenate %89, %92 in 1 : vector<8x4xf32>, vector<8x4xf32> -> vector<8x8xf32>
    %94 = arith.truncf %93 : vector<8x8xf32> to vector<8x8xbf16>
    %c0_33 = arith.constant 0 : index
    %c0_34 = arith.constant 0 : index
    %c0_35 = arith.constant 0 : index
    %c0_36 = arith.constant 0 : index
    %95 = vector.load %arg12[%c0_33, %c0_34, %c0_35, %c0_36] : memref<1x4x8x8xbf16, #tpu.memory_space<vmem>>, vector<1x1x8x8xbf16>
    %96 = vector.shape_cast %95 : vector<1x1x8x8xbf16> to vector<8x8xbf16>
    %97 = vector.shape_cast %94 : vector<8x8xbf16> to vector<1x1x8x8xbf16>
    tpu.vector_store %arg12[%c0_33, %c0_34, %c0_35, %c0_36], %97 {strides = array<i32>} : memref<1x4x8x8xbf16, #tpu.memory_space<vmem>>, vector<1x1x8x8xbf16>,
    %98 = arith.truncf %45 : vector<8x8xf32> to vector<8x8xbf16>
    %c0_37 = arith.constant 0 : index
    %c0_38 = arith.constant 0 : index
    %c0_39 = arith.constant 0 : index
    %c0_40 = arith.constant 0 : index
    %99 = vector.load %arg13[%c0_37, %c0_38, %c0_39, %c0_40] : memref<1x4x8x8xbf16, #tpu.memory_space<vmem>>, vector<1x1x8x8xbf16>
    %100 = vector.shape_cast %99 : vector<1x1x8x8xbf16> to vector<8x8xbf16>
    %101 = vector.shape_cast %98 : vector<8x8xbf16> to vector<1x1x8x8xbf16>
    tpu.vector_store %arg13[%c0_37, %c0_38, %c0_39, %c0_40], %101 {strides = array<i32>} : memref<1x4x8x8xbf16, #tpu.memory_space<vmem>>, vector<1x1x8x8xbf16>,
    %102 = vector.extract_strided_slice %34 {offsets = [0, 24], sizes = [8, 8], strides = [1, 1]} : vector<8x96xf32> to vector<8x8xf32>
    %103 = vector.extract_strided_slice %34 {offsets = [0, 32], sizes = [8, 8], strides = [1, 1]} : vector<8x96xf32> to vector<8x8xf32>
    %104 = vector.extract_strided_slice %34 {offsets = [0, 40], sizes = [8, 8], strides = [1, 1]} : vector<8x96xf32> to vector<8x8xf32>
    %105 = arith.mulf %102, %102 : vector<8x8xf32>
    %cst_41 = arith.constant dense<0.000000e+00> : vector<8xf32>
    %106 = vector.multi_reduction <add>, %105, %cst_41 [1] : vector<8x8xf32> to vector<8xf32>
    %107 = vector.shape_cast %106 : vector<8xf32> to vector<8x1xf32>
    %cst_42 = arith.constant 8.000000e+00 : f32
    %108 = vector.broadcast %cst_42 : f32 to vector<8x1xf32>
    %109 = arith.divf %107, %108 : vector<8x1xf32>
    %cst_43 = arith.constant 9.99999997E-7 : f32
    %110 = vector.broadcast %cst_43 : f32 to vector<8x1xf32>
    %111 = arith.addf %109, %110 : vector<8x1xf32>
    %112 = math.rsqrt %111 : vector<8x1xf32>
    %113 = vector.broadcast %112 : vector<8x1xf32> to vector<8x8xf32>
    %114 = arith.mulf %102, %113 : vector<8x8xf32>
    %115 = vector.broadcast %41 : vector<1x8xf32> to vector<8x8xf32>
    %116 = arith.mulf %114, %115 : vector<8x8xf32>
    %117 = arith.mulf %103, %103 : vector<8x8xf32>
    %cst_44 = arith.constant dense<0.000000e+00> : vector<8xf32>
    %118 = vector.multi_reduction <add>, %117, %cst_44 [1] : vector<8x8xf32> to vector<8xf32>
    %119 = vector.shape_cast %118 : vector<8xf32> to vector<8x1xf32>
    %cst_45 = arith.constant 8.000000e+00 : f32
    %120 = vector.broadcast %cst_45 : f32 to vector<8x1xf32>
    %121 = arith.divf %119, %120 : vector<8x1xf32>
    %cst_46 = arith.constant 9.99999997E-7 : f32
    %122 = vector.broadcast %cst_46 : f32 to vector<8x1xf32>
    %123 = arith.addf %121, %122 : vector<8x1xf32>
    %124 = math.rsqrt %123 : vector<8x1xf32>
    %125 = vector.broadcast %124 : vector<8x1xf32> to vector<8x8xf32>
    %126 = arith.mulf %103, %125 : vector<8x8xf32>
    %127 = vector.broadcast %42 : vector<1x8xf32> to vector<8x8xf32>
    %128 = arith.mulf %126, %127 : vector<8x8xf32>
    %129 = vector.extract_strided_slice %116 {offsets = [0, 0], sizes = [8, 4], strides = [1, 1]} : vector<8x8xf32> to vector<8x4xf32>
    %130 = vector.extract_strided_slice %116 {offsets = [0, 4], sizes = [8, 4], strides = [1, 1]} : vector<8x8xf32> to vector<8x4xf32>
    %131 = arith.mulf %37, %129 : vector<8x4xf32>
    %132 = arith.mulf %39, %130 : vector<8x4xf32>
    %133 = arith.addf %131, %132 : vector<8x4xf32>
    %134 = arith.mulf %38, %130 : vector<8x4xf32>
    %135 = arith.mulf %40, %129 : vector<8x4xf32>
    %136 = arith.addf %134, %135 : vector<8x4xf32>
    %137 = tpu.concatenate %133, %136 in 1 : vector<8x4xf32>, vector<8x4xf32> -> vector<8x8xf32>
    %cst_47 = arith.constant 0.353553385 : f32
    %138 = vector.broadcast %cst_47 : f32 to vector<8x8xf32>
    %139 = arith.mulf %137, %138 : vector<8x8xf32>
    %140 = arith.truncf %139 : vector<8x8xf32> to vector<8x8xbf16>
    %c0_48 = arith.constant 0 : index
    %c1 = arith.constant 1 : index
    %c0_49 = arith.constant 0 : index
    %c0_50 = arith.constant 0 : index
    %141 = vector.load %arg11[%c0_48, %c1, %c0_49, %c0_50] : memref<1x4x8x8xbf16, #tpu.memory_space<vmem>>, vector<1x1x8x8xbf16>
    %142 = vector.shape_cast %141 : vector<1x1x8x8xbf16> to vector<8x8xbf16>
    %143 = vector.shape_cast %140 : vector<8x8xbf16> to vector<1x1x8x8xbf16>
    tpu.vector_store %arg11[%c0_48, %c1, %c0_49, %c0_50], %143 {strides = array<i32>} : memref<1x4x8x8xbf16, #tpu.memory_space<vmem>>, vector<1x1x8x8xbf16>,
    %144 = vector.extract_strided_slice %128 {offsets = [0, 0], sizes = [8, 4], strides = [1, 1]} : vector<8x8xf32> to vector<8x4xf32>
    %145 = vector.extract_strided_slice %128 {offsets = [0, 4], sizes = [8, 4], strides = [1, 1]} : vector<8x8xf32> to vector<8x4xf32>
    %146 = arith.mulf %37, %144 : vector<8x4xf32>
    %147 = arith.mulf %39, %145 : vector<8x4xf32>
    %148 = arith.addf %146, %147 : vector<8x4xf32>
    %149 = arith.mulf %38, %145 : vector<8x4xf32>
    %150 = arith.mulf %40, %144 : vector<8x4xf32>
    %151 = arith.addf %149, %150 : vector<8x4xf32>
    %152 = tpu.concatenate %148, %151 in 1 : vector<8x4xf32>, vector<8x4xf32> -> vector<8x8xf32>
    %153 = arith.truncf %152 : vector<8x8xf32> to vector<8x8xbf16>
    %c0_51 = arith.constant 0 : index
    %c1_52 = arith.constant 1 : index
    %c0_53 = arith.constant 0 : index
    %c0_54 = arith.constant 0 : index
    %154 = vector.load %arg12[%c0_51, %c1_52, %c0_53, %c0_54] : memref<1x4x8x8xbf16, #tpu.memory_space<vmem>>, vector<1x1x8x8xbf16>
    %155 = vector.shape_cast %154 : vector<1x1x8x8xbf16> to vector<8x8xbf16>
    %156 = vector.shape_cast %153 : vector<8x8xbf16> to vector<1x1x8x8xbf16>
    tpu.vector_store %arg12[%c0_51, %c1_52, %c0_53, %c0_54], %156 {strides = array<i32>} : memref<1x4x8x8xbf16, #tpu.memory_space<vmem>>, vector<1x1x8x8xbf16>,
    %157 = arith.truncf %104 : vector<8x8xf32> to vector<8x8xbf16>
    %c0_55 = arith.constant 0 : index
    %c1_56 = arith.constant 1 : index
    %c0_57 = arith.constant 0 : index
    %c0_58 = arith.constant 0 : index
    %158 = vector.load %arg13[%c0_55, %c1_56, %c0_57, %c0_58] : memref<1x4x8x8xbf16, #tpu.memory_space<vmem>>, vector<1x1x8x8xbf16>
    %159 = vector.shape_cast %158 : vector<1x1x8x8xbf16> to vector<8x8xbf16>
    %160 = vector.shape_cast %157 : vector<8x8xbf16> to vector<1x1x8x8xbf16>
    tpu.vector_store %arg13[%c0_55, %c1_56, %c0_57, %c0_58], %160 {strides = array<i32>} : memref<1x4x8x8xbf16, #tpu.memory_space<vmem>>, vector<1x1x8x8xbf16>,
    %161 = vector.extract_strided_slice %34 {offsets = [0, 48], sizes = [8, 8], strides = [1, 1]} : vector<8x96xf32> to vector<8x8xf32>
    %162 = vector.extract_strided_slice %34 {offsets = [0, 56], sizes = [8, 8], strides = [1, 1]} : vector<8x96xf32> to vector<8x8xf32>
    %163 = vector.extract_strided_slice %34 {offsets = [0, 64], sizes = [8, 8], strides = [1, 1]} : vector<8x96xf32> to vector<8x8xf32>
    %164 = arith.mulf %161, %161 : vector<8x8xf32>
    %cst_59 = arith.constant dense<0.000000e+00> : vector<8xf32>
    %165 = vector.multi_reduction <add>, %164, %cst_59 [1] : vector<8x8xf32> to vector<8xf32>
    %166 = vector.shape_cast %165 : vector<8xf32> to vector<8x1xf32>
    %cst_60 = arith.constant 8.000000e+00 : f32
    %167 = vector.broadcast %cst_60 : f32 to vector<8x1xf32>
    %168 = arith.divf %166, %167 : vector<8x1xf32>
    %cst_61 = arith.constant 9.99999997E-7 : f32
    %169 = vector.broadcast %cst_61 : f32 to vector<8x1xf32>
    %170 = arith.addf %168, %169 : vector<8x1xf32>
    %171 = math.rsqrt %170 : vector<8x1xf32>
    %172 = vector.broadcast %171 : vector<8x1xf32> to vector<8x8xf32>
    %173 = arith.mulf %161, %172 : vector<8x8xf32>
    %174 = vector.broadcast %41 : vector<1x8xf32> to vector<8x8xf32>
    %175 = arith.mulf %173, %174 : vector<8x8xf32>
    %176 = arith.mulf %162, %162 : vector<8x8xf32>
    %cst_62 = arith.constant dense<0.000000e+00> : vector<8xf32>
    %177 = vector.multi_reduction <add>, %176, %cst_62 [1] : vector<8x8xf32> to vector<8xf32>
    %178 = vector.shape_cast %177 : vector<8xf32> to vector<8x1xf32>
    %cst_63 = arith.constant 8.000000e+00 : f32
    %179 = vector.broadcast %cst_63 : f32 to vector<8x1xf32>
    %180 = arith.divf %178, %179 : vector<8x1xf32>
    %cst_64 = arith.constant 9.99999997E-7 : f32
    %181 = vector.broadcast %cst_64 : f32 to vector<8x1xf32>
    %182 = arith.addf %180, %181 : vector<8x1xf32>
    %183 = math.rsqrt %182 : vector<8x1xf32>
    %184 = vector.broadcast %183 : vector<8x1xf32> to vector<8x8xf32>
    %185 = arith.mulf %162, %184 : vector<8x8xf32>
    %186 = vector.broadcast %42 : vector<1x8xf32> to vector<8x8xf32>
    %187 = arith.mulf %185, %186 : vector<8x8xf32>
    %188 = vector.extract_strided_slice %175 {offsets = [0, 0], sizes = [8, 4], strides = [1, 1]} : vector<8x8xf32> to vector<8x4xf32>
    %189 = vector.extract_strided_slice %175 {offsets = [0, 4], sizes = [8, 4], strides = [1, 1]} : vector<8x8xf32> to vector<8x4xf32>
    %190 = arith.mulf %37, %188 : vector<8x4xf32>
    %191 = arith.mulf %39, %189 : vector<8x4xf32>
    %192 = arith.addf %190, %191 : vector<8x4xf32>
    %193 = arith.mulf %38, %189 : vector<8x4xf32>
    %194 = arith.mulf %40, %188 : vector<8x4xf32>
    %195 = arith.addf %193, %194 : vector<8x4xf32>
    %196 = tpu.concatenate %192, %195 in 1 : vector<8x4xf32>, vector<8x4xf32> -> vector<8x8xf32>
    %cst_65 = arith.constant 0.353553385 : f32
    %197 = vector.broadcast %cst_65 : f32 to vector<8x8xf32>
    %198 = arith.mulf %196, %197 : vector<8x8xf32>
    %199 = arith.truncf %198 : vector<8x8xf32> to vector<8x8xbf16>
    %c0_66 = arith.constant 0 : index
    %c2 = arith.constant 2 : index
    %c0_67 = arith.constant 0 : index
    %c0_68 = arith.constant 0 : index
    %200 = vector.load %arg11[%c0_66, %c2, %c0_67, %c0_68] : memref<1x4x8x8xbf16, #tpu.memory_space<vmem>>, vector<1x1x8x8xbf16>
    %201 = vector.shape_cast %200 : vector<1x1x8x8xbf16> to vector<8x8xbf16>
    %202 = vector.shape_cast %199 : vector<8x8xbf16> to vector<1x1x8x8xbf16>
    tpu.vector_store %arg11[%c0_66, %c2, %c0_67, %c0_68], %202 {strides = array<i32>} : memref<1x4x8x8xbf16, #tpu.memory_space<vmem>>, vector<1x1x8x8xbf16>,
    %203 = vector.extract_strided_slice %187 {offsets = [0, 0], sizes = [8, 4], strides = [1, 1]} : vector<8x8xf32> to vector<8x4xf32>
    %204 = vector.extract_strided_slice %187 {offsets = [0, 4], sizes = [8, 4], strides = [1, 1]} : vector<8x8xf32> to vector<8x4xf32>
    %205 = arith.mulf %37, %203 : vector<8x4xf32>
    %206 = arith.mulf %39, %204 : vector<8x4xf32>
    %207 = arith.addf %205, %206 : vector<8x4xf32>
    %208 = arith.mulf %38, %204 : vector<8x4xf32>
    %209 = arith.mulf %40, %203 : vector<8x4xf32>
    %210 = arith.addf %208, %209 : vector<8x4xf32>
    %211 = tpu.concatenate %207, %210 in 1 : vector<8x4xf32>, vector<8x4xf32> -> vector<8x8xf32>
    %212 = arith.truncf %211 : vector<8x8xf32> to vector<8x8xbf16>
    %c0_69 = arith.constant 0 : index
    %c2_70 = arith.constant 2 : index
    %c0_71 = arith.constant 0 : index
    %c0_72 = arith.constant 0 : index
    %213 = vector.load %arg12[%c0_69, %c2_70, %c0_71, %c0_72] : memref<1x4x8x8xbf16, #tpu.memory_space<vmem>>, vector<1x1x8x8xbf16>
    %214 = vector.shape_cast %213 : vector<1x1x8x8xbf16> to vector<8x8xbf16>
    %215 = vector.shape_cast %212 : vector<8x8xbf16> to vector<1x1x8x8xbf16>
    tpu.vector_store %arg12[%c0_69, %c2_70, %c0_71, %c0_72], %215 {strides = array<i32>} : memref<1x4x8x8xbf16, #tpu.memory_space<vmem>>, vector<1x1x8x8xbf16>,
    %216 = arith.truncf %163 : vector<8x8xf32> to vector<8x8xbf16>
    %c0_73 = arith.constant 0 : index
    %c2_74 = arith.constant 2 : index
    %c0_75 = arith.constant 0 : index
    %c0_76 = arith.constant 0 : index
    %217 = vector.load %arg13[%c0_73, %c2_74, %c0_75, %c0_76] : memref<1x4x8x8xbf16, #tpu.memory_space<vmem>>, vector<1x1x8x8xbf16>
    %218 = vector.shape_cast %217 : vector<1x1x8x8xbf16> to vector<8x8xbf16>
    %219 = vector.shape_cast %216 : vector<8x8xbf16> to vector<1x1x8x8xbf16>
    tpu.vector_store %arg13[%c0_73, %c2_74, %c0_75, %c0_76], %219 {strides = array<i32>} : memref<1x4x8x8xbf16, #tpu.memory_space<vmem>>, vector<1x1x8x8xbf16>,
    %220 = vector.extract_strided_slice %34 {offsets = [0, 72], sizes = [8, 8], strides = [1, 1]} : vector<8x96xf32> to vector<8x8xf32>
    %221 = vector.extract_strided_slice %34 {offsets = [0, 80], sizes = [8, 8], strides = [1, 1]} : vector<8x96xf32> to vector<8x8xf32>
    %222 = vector.extract_strided_slice %34 {offsets = [0, 88], sizes = [8, 8], strides = [1, 1]} : vector<8x96xf32> to vector<8x8xf32>
    %223 = arith.mulf %220, %220 : vector<8x8xf32>
    %cst_77 = arith.constant dense<0.000000e+00> : vector<8xf32>
    %224 = vector.multi_reduction <add>, %223, %cst_77 [1] : vector<8x8xf32> to vector<8xf32>
    %225 = vector.shape_cast %224 : vector<8xf32> to vector<8x1xf32>
    %cst_78 = arith.constant 8.000000e+00 : f32
    %226 = vector.broadcast %cst_78 : f32 to vector<8x1xf32>
    %227 = arith.divf %225, %226 : vector<8x1xf32>
    %cst_79 = arith.constant 9.99999997E-7 : f32
    %228 = vector.broadcast %cst_79 : f32 to vector<8x1xf32>
    %229 = arith.addf %227, %228 : vector<8x1xf32>
    %230 = math.rsqrt %229 : vector<8x1xf32>
    %231 = vector.broadcast %230 : vector<8x1xf32> to vector<8x8xf32>
    %232 = arith.mulf %220, %231 : vector<8x8xf32>
    %233 = vector.broadcast %41 : vector<1x8xf32> to vector<8x8xf32>
    %234 = arith.mulf %232, %233 : vector<8x8xf32>
    %235 = arith.mulf %221, %221 : vector<8x8xf32>
    %cst_80 = arith.constant dense<0.000000e+00> : vector<8xf32>
    %236 = vector.multi_reduction <add>, %235, %cst_80 [1] : vector<8x8xf32> to vector<8xf32>
    %237 = vector.shape_cast %236 : vector<8xf32> to vector<8x1xf32>
    %cst_81 = arith.constant 8.000000e+00 : f32
    %238 = vector.broadcast %cst_81 : f32 to vector<8x1xf32>
    %239 = arith.divf %237, %238 : vector<8x1xf32>
    %cst_82 = arith.constant 9.99999997E-7 : f32
    %240 = vector.broadcast %cst_82 : f32 to vector<8x1xf32>
    %241 = arith.addf %239, %240 : vector<8x1xf32>
    %242 = math.rsqrt %241 : vector<8x1xf32>
    %243 = vector.broadcast %242 : vector<8x1xf32> to vector<8x8xf32>
    %244 = arith.mulf %221, %243 : vector<8x8xf32>
    %245 = vector.broadcast %42 : vector<1x8xf32> to vector<8x8xf32>
    %246 = arith.mulf %244, %245 : vector<8x8xf32>
    %247 = vector.extract_strided_slice %234 {offsets = [0, 0], sizes = [8, 4], strides = [1, 1]} : vector<8x8xf32> to vector<8x4xf32>
    %248 = vector.extract_strided_slice %234 {offsets = [0, 4], sizes = [8, 4], strides = [1, 1]} : vector<8x8xf32> to vector<8x4xf32>
    %249 = arith.mulf %37, %247 : vector<8x4xf32>
    %250 = arith.mulf %39, %248 : vector<8x4xf32>
    %251 = arith.addf %249, %250 : vector<8x4xf32>
    %252 = arith.mulf %38, %248 : vector<8x4xf32>
    %253 = arith.mulf %40, %247 : vector<8x4xf32>
    %254 = arith.addf %252, %253 : vector<8x4xf32>
    %255 = tpu.concatenate %251, %254 in 1 : vector<8x4xf32>, vector<8x4xf32> -> vector<8x8xf32>
    %cst_83 = arith.constant 0.353553385 : f32
    %256 = vector.broadcast %cst_83 : f32 to vector<8x8xf32>
    %257 = arith.mulf %255, %256 : vector<8x8xf32>
    %258 = arith.truncf %257 : vector<8x8xf32> to vector<8x8xbf16>
    %c0_84 = arith.constant 0 : index
    %c3 = arith.constant 3 : index
    %c0_85 = arith.constant 0 : index
    %c0_86 = arith.constant 0 : index
    %259 = vector.load %arg11[%c0_84, %c3, %c0_85, %c0_86] : memref<1x4x8x8xbf16, #tpu.memory_space<vmem>>, vector<1x1x8x8xbf16>
    %260 = vector.shape_cast %259 : vector<1x1x8x8xbf16> to vector<8x8xbf16>
    %261 = vector.shape_cast %258 : vector<8x8xbf16> to vector<1x1x8x8xbf16>
    tpu.vector_store %arg11[%c0_84, %c3, %c0_85, %c0_86], %261 {strides = array<i32>} : memref<1x4x8x8xbf16, #tpu.memory_space<vmem>>, vector<1x1x8x8xbf16>,
    %262 = vector.extract_strided_slice %246 {offsets = [0, 0], sizes = [8, 4], strides = [1, 1]} : vector<8x8xf32> to vector<8x4xf32>
    %263 = vector.extract_strided_slice %246 {offsets = [0, 4], sizes = [8, 4], strides = [1, 1]} : vector<8x8xf32> to vector<8x4xf32>
    %264 = arith.mulf %37, %262 : vector<8x4xf32>
    %265 = arith.mulf %39, %263 : vector<8x4xf32>
    %266 = arith.addf %264, %265 : vector<8x4xf32>
    %267 = arith.mulf %38, %263 : vector<8x4xf32>
    %268 = arith.mulf %40, %262 : vector<8x4xf32>
    %269 = arith.addf %267, %268 : vector<8x4xf32>
    %270 = tpu.concatenate %266, %269 in 1 : vector<8x4xf32>, vector<8x4xf32> -> vector<8x8xf32>
    %271 = arith.truncf %270 : vector<8x8xf32> to vector<8x8xbf16>
    %c0_87 = arith.constant 0 : index
    %c3_88 = arith.constant 3 : index
    %c0_89 = arith.constant 0 : index
    %c0_90 = arith.constant 0 : index
    %272 = vector.load %arg12[%c0_87, %c3_88, %c0_89, %c0_90] : memref<1x4x8x8xbf16, #tpu.memory_space<vmem>>, vector<1x1x8x8xbf16>
    %273 = vector.shape_cast %272 : vector<1x1x8x8xbf16> to vector<8x8xbf16>
    %274 = vector.shape_cast %271 : vector<8x8xbf16> to vector<1x1x8x8xbf16>
    tpu.vector_store %arg12[%c0_87, %c3_88, %c0_89, %c0_90], %274 {strides = array<i32>} : memref<1x4x8x8xbf16, #tpu.memory_space<vmem>>, vector<1x1x8x8xbf16>,
    %275 = arith.truncf %222 : vector<8x8xf32> to vector<8x8xbf16>
    %c0_91 = arith.constant 0 : index
    %c3_92 = arith.constant 3 : index
    %c0_93 = arith.constant 0 : index
    %c0_94 = arith.constant 0 : index
    %276 = vector.load %arg13[%c0_91, %c3_92, %c0_93, %c0_94] : memref<1x4x8x8xbf16, #tpu.memory_space<vmem>>, vector<1x1x8x8xbf16>
    %277 = vector.shape_cast %276 : vector<1x1x8x8xbf16> to vector<8x8xbf16>
    %278 = vector.shape_cast %275 : vector<8x8xbf16> to vector<1x1x8x8xbf16>
    tpu.vector_store %arg13[%c0_91, %c3_92, %c0_93, %c0_94], %278 {strides = array<i32>} : memref<1x4x8x8xbf16, #tpu.memory_space<vmem>>, vector<1x1x8x8xbf16>,
    return
  }
  func.func @transform_0(%arg0: i32, %arg1: i32, %arg2: i32) -> (i32, i32, i32) {
    %c0_i32 = arith.constant 0 : i32
    %c0_i32_0 = arith.constant 0 : i32
    return %arg0, %arg2, %c0_i32 : i32, i32, i32
  }
  func.func @transform_1(%arg0: i32, %arg1: i32, %arg2: i32) -> (i32, i32, i32) {
    %c0_i32 = arith.constant 0 : i32
    %c0_i32_0 = arith.constant 0 : i32
    %c0_i32_1 = arith.constant 0 : i32
    return %arg0, %c0_i32, %c0_i32_0 : i32, i32, i32
  }
  func.func @transform_2(%arg0: i32, %arg1: i32, %arg2: i32) -> (i32, i32) {
    %c0_i32 = arith.constant 0 : i32
    %c0_i32_0 = arith.constant 0 : i32
    return %arg2, %c0_i32 : i32, i32
  }
  func.func @transform_3(%arg0: i32, %arg1: i32, %arg2: i32) -> (i32, i32) {
    %c0_i32 = arith.constant 0 : i32
    %c0_i32_0 = arith.constant 0 : i32
    return %arg2, %c0_i32 : i32, i32
  }
  func.func @transform_4(%arg0: i32, %arg1: i32, %arg2: i32) -> (i32, i32) {
    %c0_i32 = arith.constant 0 : i32
    %c0_i32_0 = arith.constant 0 : i32
    return %c0_i32, %arg1 : i32, i32
  }
  func.func @transform_5(%arg0: i32, %arg1: i32, %arg2: i32) -> (i32, i32) {
    %c0_i32 = arith.constant 0 : i32
    %c0_i32_0 = arith.constant 0 : i32
    return %c0_i32, %arg1 : i32, i32
  }
  func.func @transform_6(%arg0: i32, %arg1: i32, %arg2: i32) -> (i32, i32) {
    %c0_i32 = arith.constant 0 : i32
    %c0_i32_0 = arith.constant 0 : i32
    %c0_i32_1 = arith.constant 0 : i32
    return %c0_i32, %c0_i32_0 : i32, i32
  }
  func.func @transform_7(%arg0: i32, %arg1: i32, %arg2: i32) -> (i32, i32) {
    %c0_i32 = arith.constant 0 : i32
    %c0_i32_0 = arith.constant 0 : i32
    %c0_i32_1 = arith.constant 0 : i32
    return %c0_i32, %c0_i32_0 : i32, i32
  }
  func.func @transform_8(%arg0: i32, %arg1: i32, %arg2: i32) -> (i32, i32, i32, i32) {
    %c0_i32 = arith.constant 0 : i32
    %c0_i32_0 = arith.constant 0 : i32
    return %arg0, %arg1, %arg2, %c0_i32 : i32, i32, i32, i32
  }
  func.func @transform_9(%arg0: i32, %arg1: i32, %arg2: i32) -> (i32, i32, i32, i32) {
    %c0_i32 = arith.constant 0 : i32
    %c0_i32_0 = arith.constant 0 : i32
    return %arg0, %arg1, %arg2, %c0_i32 : i32, i32, i32, i32
  }
  func.func @transform_10(%arg0: i32, %arg1: i32, %arg2: i32) -> (i32, i32, i32, i32) {
    %c0_i32 = arith.constant 0 : i32
    %c0_i32_0 = arith.constant 0 : i32
    return %arg0, %arg1, %arg2, %c0_i32 : i32, i32, i32, i32
  }
}

</mosaic_0001>

<bundles_post_ra>
// kernel: tpu_custom_call.1
= control target key start
LH: loop header
LB: loop body
LE: loop exit
PB: predicated region body
PF: predicated region fallthrough
CT: control target
= control target key end

     0   :  { %s2988_s0 = inlined_call_operand.hbm [shape: bf16[2,16,32], index: 0, kind: input, shape index: {}]   ;;  %s2989_s1 = inlined_call_operand.hbm [shape: f32[2,1,64], index: 1, kind: input, shape index: {}]   ;;  %s2990_s2 = inlined_call_operand.hbm [shape: f32[16,8], index: 2, kind: input, shape index: {}]   ;;  %s2991_s3 = inlined_call_operand.hbm [shape: f32[16,8], index: 3, kind: input, shape index: {}]   ;;  %s2992_s4 = inlined_call_operand.hbm [shape: bf16[32,96], index: 4, kind: input, shape index: {}]   ;;  %s2993_s5 = inlined_call_operand.hbm [shape: f32[1,96], index: 5, kind: input, shape index: {}]   ;;  %s2994_s6 = inlined_call_operand.hbm [shape: f32[1,8], index: 6, kind: input, shape index: {}]   ;;  %s2995_s7 = inlined_call_operand.hbm [shape: f32[1,8], index: 7, kind: input, shape index: {}]   ;;  %s2996_s8 = inlined_call_operand.hbm [shape: bf16[2,4,16,8], index: 8, kind: output, shape index: {0}]   ;;  %s2997_s9 = inlined_call_operand.hbm [shape: bf16[2,4,16,8], index: 9, kind: output, shape index: {1}]   ;;  %s2998_s10 = inlined_call_operand.hbm [shape: bf16[2,4,16,8], index: 10, kind: output, shape index: {2}]  }
   0x1   :  { %3033 = sst [smem:[#allocation43_spill]] %s2988_s0 }
   0x2   :  { %3034 = sst [smem:[#allocation44_spill]] %s2989_s1 }
   0x3   :  { %3035 = sst [smem:[#allocation45_spill]] %s2990_s2 }
   0x4   :  { %3036 = sst [smem:[#allocation46_spill]] %s2991_s3 }
   0x5   :  { %3037 = sst [smem:[#allocation47_spill]] %s2992_s4 }
   0x6   :  { %3038 = sst [smem:[#allocation48_spill]] %s2993_s5 }
   0x7   :  { %3039 = sst [smem:[#allocation49_spill]] %s2994_s6 }
   0x8   :  { %3040 = sst [smem:[#allocation50_spill]] %s2995_s7 }
   0x9   :  { %3041 = sst [smem:[#allocation51_spill]] %s2996_s8 }
   0xa   :  { %3042 = sst [smem:[#allocation52_spill]] %s2997_s9 }
   0xb   :  { %3043 = sst [smem:[#allocation53_spill]] %s2998_s10 }
   0xc   :  { %16 = vsyncpa [#allocation3], 0 }
   0xd   :  { %18 = vsyncpa [#allocation3 + $0x1], 0 }
   0xe   :  { %19 = vsyncpa [#allocation6], 0 }
   0xf   :  { %21 = vsyncpa [#allocation6 + $0x1], 0 }
  0x10   :  { %22 = vsyncpa [#allocation9], 0 }
  0x11   :  { %24 = vsyncpa [#allocation9 + $0x1], 0 }
  0x12   :  { %25 = vsyncpa [#allocation12], 0 }
  0x13   :  { %26 = vsyncpa [#allocation15], 0 }
  0x14   :  { %27 = vsyncpa [#allocation4], 0 }
  0x15   :  { %29 = vsyncpa [#allocation4 + $0x1], 0 }
  0x16   :  { %30 = vsyncpa [#allocation18], 0 }
  0x17   :  { %32 = vsyncpa [#allocation18 + $0x1], 0  ;;  %s2206_s13 = smov 0   ;;  %s2208_s14 = smov 0  }
  0x18   :  { %s2210_s15 = smov 0   ;;  %s2212_s16 = smov 0  }
  0x19   :  { %s2214_s17 = smov 0   ;;  %s2216_s18 = smov 0  }
  0x1a   :  { %s2218_s19 = smov 0   ;;  %s2220_s20 = smov 0  }
  0x1b   :  { %s2222_s21 = smov 0   ;;  %s2224_s22 = smov 0  }
  0x1c   :  { %s2226_s23 = smov 0   ;;  %s2228_s24 = smov 0  }
  0x1d   :  { %s2230_s25 = smov 0   ;;  %s2232_s26 = smov 0  }
  0x1e LB: > { %3044 = sst [smem:[#allocation29_spill]] %s2055_s13  ;;  %s2277_s27 = sadd.s32 4294967295, %s2107_s26   ;;  %s2107_s26 = sphi %s2232_s26, %s38_s26   ;;  %s2103_s25 = sphi %s2230_s25, %s3127_s25   ;;  %s2099_s24 = sphi %s2228_s24, %s3126_s24   ;;  %s2095_s23 = sphi %s2226_s23, %s3125_s23   ;;  %s2091_s22 = sphi %s2224_s22, %s3124_s22   ;;  %s2087_s21 = sphi %s2222_s21, %s3123_s21   ;;  %s2083_s20 = sphi %s2220_s20, %s3122_s20   ;;  %s2079_s19 = sphi %s2218_s19, %s3132_s19   ;;  %s2075_s18 = sphi %s2216_s18, %s3131_s18   ;;  %s2071_s17 = sphi %s2214_s17, %s3130_s17   ;;  %s2067_s16 = sphi %s2212_s16, %s3129_s16   ;;  %s2063_s15 = sphi %s2210_s15, %s3128_s15   ;;  %s2059_s14 = sphi %s2208_s14, %s3119_s14   ;;  %s2055_s13 = sphi %s2206_s13, %s3118_s13  }
  0x1f   : > { %3045 = sst [smem:[#allocation30_spill]] %s2059_s14  ;;  %p1337_p0 = scmp.ge.s32.totalorder %s2107_s26, 1 }
  0x20   : > { %3046 = sst [smem:[#allocation31_spill]] %s2063_s15  ;;  %p3004_p1 = scmp.eq.s32.totalorder %s2277_s27, 0 }
  0x21   : > { %3047 = sst [smem:[#allocation32_spill]] %s2083_s20  ;;  %p352_p2 = scmp.lt.s32.totalorder %s2107_s26, 5 }
  0x22   : > { %3048 = sst [smem:[#allocation33_spill]] %s2087_s21  ;;  %s2109_s29 = smov [#allocation10]  }
  0x23   : > { %3049 = sst [smem:[#allocation34_spill]] %s2091_s22  ;;  %p2282_p3 = pnand %p1337_p0, %p352_p2 }
  0x24   : > { %3050 = sst [smem:[#allocation35_spill]] %s2095_s23  ;;  %s366_s30 = sshll.u32 %s2109_s29, 4  ;;  %s367_s30 = int_to_ptr.vmem [resolvable:$true] %s366_s30 }
  0x25   : > { %3051 = sst [smem:[#allocation36_spill]] %s2099_s24  ;;  %p1432_p4 = pneg %p2282_p3 }
  0x26   : > { %3052 = sst [smem:[#allocation37_spill]] %s2103_s25  ;;  %s2110_s12 = smov [#allocation11]  }
  0x27   : > { %s3053_s28 = scalar_select %p2282_p3, 1, 0 }
  0x28   : > { %p2290_p5 = pnand %p1432_p4, %p3004_p1  ;;  %s382_s10 = sshll.u32 %s2110_s12, 4  ;;  %s2294_s10 = int_to_ptr.vmem [resolvable:$true] %s382_s10 }
  0x29   : > { %3054 = sst [smem:[#allocation38_spill]] %s3053_s28  ;;  %s3056_s4 = sld [smem:[#allocation47_spill]] }
  0x2a   : > { %s3055_s11 = scalar_select %p2290_p5, 1, 0 }
  0x2b   : > { %p2304_p7 = pneg %p2290_p5 }
  0x2f   : > { %s1645_s22 = scalar_lea.hbm %s3056_s4, 256 }
  0x30   : > { %p1646_p6 = scmp.ne.s32.totalorder %s3056_s4, %s1645_s22  ;;  %p1652_p10 = scmp.lt.u32.totalorder %s1645_s22, %s3056_s4 }
  0x32   : > { %p1648_p8 = pnand %p2304_p7, %p1646_p6 }
  0x34   : > { %p1649_p9 = pneg %p1648_p8 }
  0x36   : > { %p1654_p11 = pnand %p1652_p10, %p1649_p9 }
  0x38   : > { %1657 = shalt.err (!%p1654_p11)
}
  0x39   : > { %s1658_s8 = scalar_lea.vmem %s367_s30, 256  ;;  %p1666_p2 = scmp.lt.s32.totalorder %s367_s30, %s367_s30 }
  0x3a   : > { %p1659_p12 = scmp.ne.s32.totalorder %s367_s30, %s1658_s8  ;;  %p1667_p4 = scmp.lt.s32.totalorder %s1658_s8, %s1658_s8 }
  0x3c   : > { %p1661_p13 = pnand %p1659_p12, %p2304_p7  ;;  %p1668_p1 = por %p1667_p4, %p1666_p2 }
  0x3e   : > { %p1662_p0 = pneg %p1661_p13 }
  0x40   : > { %p1669_p3 = pnand %p1668_p1, %p1662_p0 }
  0x42   : > { %1672 = shalt.err (!%p1669_p3)
}
  0x43   : > { %s2111_s3 = smov 64   ;;  %s2112_s9 = smov 4  }
  0x44   : > { %1435 = dma.hbm_to_vmem [thread:$0]  (!%p2290_p5), %s3056_s4, 256, %s367_s30, [#allocation9], %s2111_s3, %s2111_s3, %s2112_s9  }
  0x45   : > { %s3058_s5 = sld [smem:[#allocation48_spill]] }
  0x4b   : > { %s1673_s2 = scalar_lea.hbm %s3058_s5, 16 }
  0x4c   : > { %p1674_p6 = scmp.ne.s32.totalorder %s3058_s5, %s1673_s2  ;;  %p1680_p8 = scmp.lt.u32.totalorder %s1673_s2, %s3058_s5 }
  0x4e   : > { %p1676_p1 = pnand %p1674_p6, %p2304_p7 }
  0x50   : > { %p1677_p3 = pneg %p1676_p1 }
  0x52   : > { %p1682_p9 = pnand %p1680_p8, %p1677_p3 }
  0x54   : > { %1685 = shalt.err (!%p1682_p9)
}
  0x55   : > { %s1686_s30 = scalar_lea.vmem %s2294_s10, 16  ;;  %s1693_s13 = scalar_lea.vmem %s2294_s10, 32 }
  0x56   : > { %p1687_p10 = scmp.ne.s32.totalorder %s2294_s10, %s1686_s30  ;;  %p1694_p13 = scmp.lt.s32.totalorder %s2294_s10, %s2294_s10 }
  0x57   : > { %p1695_p0 = scmp.lt.s32.totalorder %s1693_s13, %s1686_s30 }
  0x58   : > { %p1689_p11 = pnand %p1687_p10, %p2304_p7 }
  0x59   : > { %p1696_p2 = por %p1695_p0, %p1694_p13 }
  0x5a   : > { %p1690_p12 = pneg %p1689_p11 }
  0x5c   : > { %p1697_p4 = pnand %p1696_p2, %p1690_p12 }
  0x5e   : > { %1700 = shalt.err (!%p1697_p4)
}
  0x5f   : > { %1438 = dma.hbm_to_vmem [thread:$0]  (!%p2290_p5), %s3058_s5, 16, %s2294_s10, [#allocation12]  }
  0x60   : > { %p3010_p6 = scmp.eq.s32.totalorder %s2107_s26, 0  ;;  %p99_p1 = scmp.ne.s32.totalorder %s2075_s18, %s2071_s17 }
  0x61   : > { %p105_p3 = scmp.ne.s32.totalorder %s2071_s17, %s2067_s16  ;;  %p3009_p8 = scmp.lt.s32.totalorder %s2107_s26, 4 }
  0x62   : > { %p101_p9 = por %p99_p1, %p3010_p6  ;;  %s3011_s9 = sand.u32 1, %s2107_s26  }
  0x63   : > { %p3059_p10 = scmp.eq.s32.totalorder %s2277_s27, 0  ;;  %s437_s22 = sand.u32 1, %s2075_s18  }
  0x64   : > { %s1346_s28 = sshll.u32 %s2103_s25, 4  ;;  %s3061_s1 = sld [smem:[#allocation44_spill]] }
  0x65   : > { %p2357_p11 = por %p105_p3, %p3059_p10  ;;  %s438_s16 = scalar_lea.vmem [#allocation5], %s437_s22 }
  0x66   : > { %s445_s30 = sshll.u32 %s438_s16, 4  ;;  %p2370_p12 = pnand %p3009_p8, %p101_p9  ;;  %s2374_s30 = int_to_ptr.vmem [resolvable:$true] %s445_s30 }
  0x67   : > { %s3060_s23 = scalar_select %p2357_p11, 1, 0 }
  0x68   : > { %s2378_s2 = scalar_lea.sflag [#allocation6], %s3011_s9  ;;  %p1703_p0 = pneg %p2370_p12 }
  0x6a   : > { %s2366_s10 = scalar_lea.hbm %s3061_s1, %s1346_s28  ;;  %s1706_s12 = scalar_lea.hbm %s3061_s1, 32 }
  0x6b   : > { %s1701_s14 = scalar_lea.hbm %s2366_s10, 16  ;;  %p1707_p1 = scmp.lt.u32.totalorder %s2366_s10, %s3061_s1 }
  0x6c   : > { %p1702_p13 = scmp.ne.s32.totalorder %s2366_s10, %s1701_s14  ;;  %p1708_p3 = scmp.lt.u32.totalorder %s1706_s12, %s1701_s14 }
  0x6d   : > { %p1710_p10 = scmp.lt.u32.totalorder %s1701_s14, %s2366_s10 }
  0x6e   : > { %p1704_p2 = pnand %p1703_p0, %p1702_p13  ;;  %p1709_p9 = por %p1708_p3, %p1707_p1 }
  0x70   : > { %p1705_p4 = pneg %p1704_p2  ;;  %p1711_p8 = por %p1710_p10, %p1709_p9 }
  0x72   : > { %p1712_p6 = pnand %p1711_p8, %p1705_p4 }
  0x74   : > { %1715 = shalt.err (!%p1712_p6)
}
  0x75   : > { %s1716_s9 = scalar_lea.vmem %s2374_s30, 16  ;;  %s2113_s22 = smov [#allocation5]  }
  0x76   : > { %p1717_p13 = scmp.ne.s32.totalorder %s2374_s30, %s1716_s9  ;;  %s1721_s28 = sshll.u32 %s2113_s22, 4  ;;  %s1722_s28 = int_to_ptr.vmem [resolvable:$false] %s1721_s28 }
  0x77   : > { %s1723_s8 = scalar_lea.vmem %s1722_s28, 32  ;;  %p1724_p5 = scmp.lt.s32.totalorder %s2374_s30, %s1722_s28 }
  0x78   : > { %p1719_p2 = pnand %p1717_p13, %p1703_p0  ;;  %p1725_p1 = scmp.lt.s32.totalorder %s1723_s8, %s1716_s9 }
  0x7a   : > { %p1720_p11 = pneg %p1719_p2  ;;  %p1726_p3 = por %p1725_p1, %p1724_p5 }
  0x7c   : > { %p1727_p9 = pnand %p1726_p3, %p1720_p11 }
  0x7e   : > { %1730 = shalt.err (!%p1727_p9)
}
  0x7f   : > { %1451 = dma.hbm_to_vmem [thread:$0]  (!%p2370_p12), %s2366_s10, 16, %s2374_s30, %s2378_s2  }
  0x80   : > { %s2114_s14 = smov [#allocation13]   ;;  %s2115_s16 = smov [#allocation14]  }
  0x81   : > { %s393_s12 = sshll.u32 %s2114_s14, 4  ;;  %s404_s3 = sshll.u32 %s2115_s16, 4  ;;  %s394_s12 = int_to_ptr.vmem [resolvable:$true] %s393_s12  ;;  %s405_s3 = int_to_ptr.vmem [resolvable:$true] %s404_s3 }
  0x82   : > { %s3063_s6 = sld [smem:[#allocation49_spill]] }
  0x88   : > { %s1731_s28 = scalar_lea.hbm %s3063_s6, 16 }
  0x89   : > { %p1732_p5 = scmp.ne.s32.totalorder %s3063_s6, %s1731_s28  ;;  %p1738_p11 = scmp.lt.u32.totalorder %s1731_s28, %s3063_s6 }
  0x8b   : > { %p1734_p6 = pnand %p1732_p5, %p2304_p7 }
  0x8d   : > { %p1735_p8 = pneg %p1734_p6 }
  0x8f   : > { %p1740_p12 = pnand %p1738_p11, %p1735_p8 }
  0x91   : > { %1743 = shalt.err (!%p1740_p12)
}
  0x92   : > { %s1744_s10 = scalar_lea.vmem %s394_s12, 16  ;;  %s1751_s15 = scalar_lea.vmem %s394_s12, 32 }
  0x93   : > { %p1745_p0 = scmp.ne.s32.totalorder %s394_s12, %s1744_s10  ;;  %p1752_p13 = scmp.lt.s32.totalorder %s394_s12, %s394_s12 }
  0x94   : > { %p1753_p2 = scmp.lt.s32.totalorder %s1751_s15, %s1744_s10 }
  0x95   : > { %p1747_p4 = pnand %p1745_p0, %p2304_p7 }
  0x96   : > { %p1754_p1 = por %p1753_p2, %p1752_p13 }
  0x97   : > { %p1748_p10 = pneg %p1747_p4 }
  0x99   : > { %p1755_p3 = pnand %p1754_p1, %p1748_p10 }
  0x9b   : > { %1758 = shalt.err (!%p1755_p3)
}
  0x9c   : > { %p3064_p9 = scmp.ne.s32.totalorder %s3055_s11, 0  ;;  %s3065_s7 = sld [smem:[#allocation50_spill]] }
  0x9e   : > { %1441 = dma.hbm_to_vmem [thread:$0]  (!%p3064_p9), %s3063_s6, 16, %s394_s12, [#allocation12]  }
  0xa2   : > { %s1759_s22 = scalar_lea.hbm %s3065_s7, 16 }
  0xa3   : > { %p1760_p5 = scmp.ne.s32.totalorder %s3065_s7, %s1759_s22  ;;  %p1766_p11 = scmp.lt.u32.totalorder %s1759_s22, %s3065_s7 }
  0xa5   : > { %p1762_p6 = pnand %p1760_p5, %p2304_p7 }
  0xa7   : > { %p1763_p8 = pneg %p1762_p6 }
  0xa9   : > { %p1768_p12 = pnand %p1766_p11, %p1763_p8 }
  0xab   : > { %1771 = shalt.err (!%p1768_p12)
}
  0xac   : > { %s1772_s10 = scalar_lea.vmem %s405_s3, 16  ;;  %s1779_s12 = scalar_lea.vmem %s405_s3, 32 }
  0xad   : > { %p1773_p0 = scmp.ne.s32.totalorder %s405_s3, %s1772_s10  ;;  %p1780_p13 = scmp.lt.s32.totalorder %s405_s3, %s405_s3 }
  0xae   : > { %p1781_p2 = scmp.lt.s32.totalorder %s1779_s12, %s1772_s10 }
  0xaf   : > { %p1775_p4 = pnand %p1773_p0, %p2304_p7 }
  0xb0   : > { %p1782_p1 = por %p1781_p2, %p1780_p13 }
  0xb1   : > { %p1776_p10 = pneg %p1775_p4 }
  0xb3   : > { %p1783_p3 = pnand %p1782_p1, %p1776_p10 }
  0xb5   : > { %1786 = shalt.err (!%p1783_p3)
}
  0xb6   : > { %1444 = dma.hbm_to_vmem [thread:$0]  (!%p3064_p9), %s3065_s7, 16, %s405_s3, [#allocation15]  }
  0xb7   : > { %s3015_s11 = sadd.s32 4294967294, %s2107_s26   ;;  %s50_s29 = sadd.s32 1, %s2099_s24 }
  0xb8   : > { %s66_s14 = sadd.s32 1, %s2087_s21  ;;  %p51_p7 = scmp.ge.s32.totalorder %s50_s29, 2 }
  0xb9   : > { %p73_p5 = scmp.ne.s32.totalorder %s2087_s21, %s2083_s20  ;;  %p79_p6 = scmp.ne.s32.totalorder %s2083_s20, %s2079_s19 }
  0xba   : > { %p279_p8 = scmp.eq.s32.totalorder %s2277_s27, 3  ;;  %s3134_s29 = smov (%p51_p7, %s50_s29), 0 }
  0xbb   : > { %3066 = sst [smem:[#allocation39_spill]] %s3134_s29  ;;  %s3067_s1 = sadd.s32 1, %s2103_s25 }
  0xbc   : > { %s3136_s1 = smov (!%p51_p7, %s3067_s1), %s2103_s25  ;;  %s2457_s3 = ssub.s32 %s2099_s24, %s3134_s29 }
  0xbd   : > { %p3068_p9 = scmp.eq.s32.totalorder %s2107_s26, 0  ;;  %p59_p12 = scmp.ge.s32.totalorder %s3136_s1, 2 }
  0xbe   : > { %p3070_p0 = scmp.eq.s32.totalorder %s2277_s27, 0  ;;  %p2475_p13 = por %p279_p8, %p73_p5 }
  0xbf   : > { %p2461_p11 = por %p3068_p9, %p73_p5  ;;  %s3138_s1 = smov (%p59_p12, %s3136_s1), 0 }
  0xc0   : > { %p2470_p4 = por %p3070_p0, %p79_p6  ;;  %3074 = sst [smem:[#allocation41_spill]] %s3138_s1 }
  0xc1   : > { %s3072_s28 = scalar_select %p2475_p13, 1, 0 }
  0xc2   : > { %s3071_s22 = scalar_select %p2470_p4, 1, 0 }
  0xc3   : > { %3073 = sst [smem:[#allocation40_spill]] %s3072_s28  ;;  %p285_p2 = scmp.eq.s32.totalorder %s3015_s11, 3 }
  0xc4   : > { %s415_s9 = sand.u32 1, %s2087_s21   ;;  %s61_s8 = ssub.s32 %s2103_s25, %s3138_s1 }
  0xc5   : > { %s63_s13 = sor.u32 %s2457_s3, %s61_s8  ;;  %p90_p1 = scmp.eq.s32.totalorder %s61_s8, 0 }
  0xc6   : > { %p64_p3 = scmp.eq.s32.totalorder %s63_s13, 0  ;;  %p2490_p7 = por %p285_p2, %p79_p6 }
  0xc7   : > { %s3076_s12 = sadd.s32 1, %s2075_s18  ;;  %s1343_s4 = sshll.u32 %s415_s9, 2 }
  0xc8   : > { %s3075_s10 = scalar_select %p2490_p7, 1, 0 }
  0xc9   : > { %s2497_s15 = scalar_select %p90_p1, %s2075_s18, %s3076_s12  }
  0xca   : > { %s2500_s30 = scalar_select %p64_p3, %s2087_s21, %s66_s14  }
  0xcb   : > { %s1344_s5 = sshll.u32 %s2103_s25, 1  ;;  %s419_s7 = scalar_lea.vmem [#allocation2], %s1343_s4 }
  0xcc   : > { %3077 = sst [smem:[#allocation42_spill]] %s2500_s30  ;;  %s424_s11 = sadd.s32 %s2099_s24, %s1344_s5 }
  0xcd   : > { %s1345_s6 = sshll.u32 %s424_s11, 6  ;;  %s428_s29 = sshll.u32 %s419_s7, 4  ;;  %s2509_s29 = int_to_ptr.vmem [resolvable:$true] %s428_s29 }
  0xce   : > { %s3078_s0 = sld [smem:[#allocation43_spill]]  ;;  %p3079_p5 = scmp.lt.s32.totalorder %s2107_s26, 4 }
  0xcf   : > { %s416_s4 = scalar_lea.sflag [#allocation3], %s415_s9 }
  0xd0   : > { %p2515_p6 = pnand %p3079_p5, %p2461_p11 }
  0xd2   : > { %p1789_p9 = pneg %p2515_p6 }
  0xd4   : > { %s2507_s8 = scalar_lea.hbm %s3078_s0, %s1345_s6  ;;  %s1792_s11 = scalar_lea.hbm %s3078_s0, 256 }
  0xd5   : > { %s1787_s5 = scalar_lea.hbm %s2507_s8, 64  ;;  %p1793_p11 = scmp.lt.u32.totalorder %s2507_s8, %s3078_s0 }
  0xd6   : > { %p1788_p8 = scmp.ne.s32.totalorder %s2507_s8, %s1787_s5  ;;  %p1794_p2 = scmp.lt.u32.totalorder %s1792_s11, %s1787_s5 }
  0xd7   : > { %p1796_p3 = scmp.lt.u32.totalorder %s1787_s5, %s2507_s8 }
  0xd8   : > { %p1790_p12 = pnand %p1789_p9, %p1788_p8  ;;  %p1795_p1 = por %p1794_p2, %p1793_p11 }
  0xda   : > { %p1791_p0 = pneg %p1790_p12  ;;  %p1797_p5 = por %p1796_p3, %p1795_p1 }
  0xdc   : > { %p1798_p10 = pnand %p1797_p5, %p1791_p0 }
  0xde   : > { %1801 = shalt.err (!%p1798_p10)
}
  0xdf   : > { %s1802_s28 = scalar_lea.vmem %s2509_s29, 64  ;;  %s2116_s9 = smov [#allocation2]  }
  0xe0   : > { %p1803_p8 = scmp.ne.s32.totalorder %s2509_s29, %s1802_s28  ;;  %s1807_s13 = sshll.u32 %s2116_s9, 4  ;;  %s1808_s13 = int_to_ptr.vmem [resolvable:$false] %s1807_s13 }
  0xe1   : > { %s1809_s12 = scalar_lea.vmem %s1808_s13, 128  ;;  %p1810_p13 = scmp.lt.s32.totalorder %s2509_s29, %s1808_s13 }
  0xe2   : > { %p1805_p12 = pnand %p1803_p8, %p1789_p9  ;;  %p1811_p11 = scmp.lt.s32.totalorder %s1809_s12, %s1802_s28 }
  0xe4   : > { %p1806_p7 = pneg %p1805_p12  ;;  %p1812_p2 = por %p1811_p11, %p1810_p13 }
  0xe6   : > { %p1813_p1 = pnand %p1812_p2, %p1806_p7 }
  0xe8   : > { %1816 = shalt.err (!%p1813_p1)
}
  0xe9   : > { %s3081_s5 = sld [smem:[#allocation31_spill]]  ;;  %s3082_s6 = sld [smem:[#allocation30_spill]] }
  0xea   : > { %s3083_s7 = sld [smem:[#allocation29_spill]]  ;;  %p3084_p13 = scmp.eq.s32.totalorder %s2457_s3, 0 }
  0xeb   : > { %1448 = dma.hbm_to_vmem [thread:$0]  (!%p2515_p6), %s2507_s8, 64, %s2509_s29, %s416_s4  }
  0xec   : > { %p3085_p7 = scmp.eq.s32.totalorder %s2107_s26, 0  ;;  %s1348_s16 = sshll.u32 %s2099_s24, 7 }
  0xed   : > { %p3086_p3 = scmp.eq.s32.totalorder %s2277_s27, 0  ;;  %s3088_s29 = sld [smem:[#allocation45_spill]] }
  0xee   : > { %p3089_p6 = scmp.lt.s32.totalorder %s2107_s26, 4 }
  0xef   : > { %s118_s11 = sadd.s32 1, %s3081_s5  ;;  %p125_p10 = scmp.ne.s32.totalorder %s3081_s5, %s3082_s6 }
  0xf0   : > { %s2550_s1 = scalar_select %p3084_p13, %s3081_s5, %s118_s11  }
  0xf1   : > { %p127_p9 = por %p125_p10, %p3085_p7  ;;  %p131_p0 = scmp.ne.s32.totalorder %s3082_s6, %s3083_s7 }
  0xf2   : > { %s454_s14 = sand.u32 1, %s3081_s5   ;;  %s3091_s11 = sld [smem:[#allocation46_spill]] }
  0xf3   : > { %p2560_p5 = por %p131_p0, %p3086_p3  ;;  %s2564_s9 = sshll.u32 %s454_s14, 3 }
  0xf4   : > { %s2569_s8 = scalar_lea.hbm %s3088_s29, %s1348_s16  ;;  %s456_s3 = scalar_lea.vmem [#allocation7], %s2564_s9 }
  0xf5   : > { %s3087_s28 = scalar_select %p2560_p5, 1, 0 }
  0xf6   : > { %s463_s4 = sshll.u32 %s456_s3, 4  ;;  %p2574_p8 = pnand %p3089_p6, %p127_p9  ;;  %s2578_s4 = int_to_ptr.vmem [resolvable:$true] %s463_s4 }
  0xf7   : > { %s1817_s13 = scalar_lea.hbm %s2569_s8, 128  ;;  %s1822_s0 = scalar_lea.hbm %s3088_s29, 256 }
  0xf8   : > { %s2583_s14 = scalar_lea.hbm %s3091_s11, %s1348_s16  ;;  %p1818_p12 = scmp.ne.s32.totalorder %s2569_s8, %s1817_s13 }
  0xf9   : > { %p1819_p11 = pneg %p2574_p8  ;;  %p1823_p10 = scmp.lt.u32.totalorder %s2569_s8, %s3088_s29 }
  0xfa   : > { %p1824_p13 = scmp.lt.u32.totalorder %s1822_s0, %s1817_s13  ;;  %p1826_p9 = scmp.lt.u32.totalorder %s1817_s13, %s2569_s8 }
  0xfb   : > { %p1820_p2 = pnand %p1819_p11, %p1818_p12 }
  0xfc   : > { %p1825_p7 = por %p1824_p13, %p1823_p10 }
  0xfd   : > { %p1821_p1 = pneg %p1820_p2 }
  0xfe   : > { %p1827_p0 = por %p1826_p9, %p1825_p7 }
 0x100   : > { %p1828_p3 = pnand %p1827_p0, %p1821_p1 }
 0x102   : > { %1831 = shalt.err (!%p1828_p3)
}
 0x103   : > { %s1832_s16 = scalar_lea.vmem %s2578_s4, 128  ;;  %s2117_s6 = smov [#allocation7]  }
 0x104   : > { %p1833_p6 = scmp.ne.s32.totalorder %s2578_s4, %s1832_s16  ;;  %s1837_s7 = sshll.u32 %s2117_s6, 4  ;;  %s1838_s7 = int_to_ptr.vmem [resolvable:$false] %s1837_s7 }
 0x105   : > { %s1839_s24 = scalar_lea.vmem %s1838_s7, 256  ;;  %p1840_p5 = scmp.lt.s32.totalorder %s2578_s4, %s1838_s7 }
 0x106   : > { %p1835_p12 = pnand %p1833_p6, %p1819_p11  ;;  %p1841_p10 = scmp.lt.s32.totalorder %s1839_s24, %s1832_s16 }
 0x108   : > { %p1836_p2 = pneg %p1835_p12  ;;  %p1842_p13 = por %p1841_p10, %p1840_p5 }
 0x10a   : > { %p1843_p7 = pnand %p1842_p13, %p1836_p2 }
 0x10c   : > { %1846 = shalt.err (!%p1843_p7)
}
 0x10d   : > { %1454 = dma.hbm_to_vmem [thread:$0]  (!%p2574_p8), %s2569_s8, 128, %s2578_s4, %s2378_s2  }
 0x10e   : > { %s474_s0 = scalar_lea.vmem [#allocation8], %s2564_s9  ;;  %s3092_s13 = sand.u32 1, %s2107_s26  }
 0x10f   : > { %s481_s25 = sshll.u32 %s474_s0, 4  ;;  %s471_s12 = scalar_lea.sflag [#allocation9], %s3092_s13  ;;  %s482_s25 = int_to_ptr.vmem [resolvable:$true] %s481_s25 }
 0x110   : > { %s1847_s3 = scalar_lea.hbm %s2583_s14, 128  ;;  %s1852_s7 = scalar_lea.hbm %s3091_s11, 256 }
 0x111   : > { %p1848_p5 = scmp.ne.s32.totalorder %s2583_s14, %s1847_s3  ;;  %p1853_p0 = scmp.lt.u32.totalorder %s2583_s14, %s3091_s11 }
 0x112   : > { %p1854_p3 = scmp.lt.u32.totalorder %s1852_s7, %s1847_s3  ;;  %p1856_p12 = scmp.lt.u32.totalorder %s1847_s3, %s2583_s14 }
 0x113   : > { %p1850_p1 = pnand %p1848_p5, %p1819_p11 }
 0x114   : > { %p1855_p6 = por %p1854_p3, %p1853_p0 }
 0x115   : > { %p1851_p9 = pneg %p1850_p1 }
 0x116   : > { %p1857_p2 = por %p1856_p12, %p1855_p6 }
 0x118   : > { %p1858_p10 = pnand %p1857_p2, %p1851_p9 }
 0x11a   : > { %1861 = shalt.err (!%p1858_p10)
}
 0x11b   : > { %s1862_s2 = scalar_lea.vmem %s482_s25, 128  ;;  %s2118_s9 = smov [#allocation8]  }
 0x11c   : > { %p1863_p13 = scmp.ne.s32.totalorder %s482_s25, %s1862_s2  ;;  %s1867_s8 = sshll.u32 %s2118_s9, 4  ;;  %s1868_s8 = int_to_ptr.vmem [resolvable:$false] %s1867_s8 }
 0x11d   : > { %s1869_s4 = scalar_lea.vmem %s1868_s8, 256  ;;  %p1870_p1 = scmp.lt.s32.totalorder %s482_s25, %s1868_s8 }
 0x11e   : > { %p1865_p7 = pnand %p1863_p13, %p1819_p11  ;;  %p1871_p4 = scmp.lt.s32.totalorder %s1869_s4, %s1862_s2 }
 0x120   : > { %p1866_p5 = pneg %p1865_p7  ;;  %p1872_p0 = por %p1871_p4, %p1870_p1 }
 0x122   : > { %p1873_p3 = pnand %p1872_p0, %p1866_p5 }
 0x124   : > { %1876 = shalt.err (!%p1873_p3)
}
 0x125   : > { %1457 = dma.hbm_to_vmem [thread:$0]  (!%p2574_p8), %s2583_s14, 128, %s482_s25, %s471_s12  }
 0x126   : > { %s3093_s29 = sld [smem:[#allocation38_spill]] }
 0x12c   : > { %p3094_p9 = scmp.ne.s32.totalorder %s3093_s29, 0 }
 0x12d   : > { %s2636_s0 = sand.u32 (!%p3094_p9), 1, %s2083_s20   ;;  %p3095_p11 = scmp.ne.s32.totalorder (!%p3094_p9), %s3071_s22, 0 }
 0x12e   : > { %490 = sbr.rel (%p3094_p9) target bundleno = 1386 (0x56a), region = 52  ;;  %s1352_s13 = sshll.u32 (!%p3094_p9), %s2636_s0, 2 }
 0x12f   : > { %s493_s3 = scalar_lea.sflag (!%p3094_p9), [#allocation3], %s2636_s0  ;;  %s496_s16 = scalar_lea.vmem (!%p3094_p9), [#allocation2], %s1352_s13 }
 0x135   : > { %2018 = dma.done.wait (%p3095_p11), %s493_s3, 64  }
 0x136   : > { %2020 = vsyncadd (%p3095_p11), %s493_s3, 4294967232  ;;  %s2645_s5 = sand.u32 1, %s2277_s27   ;;  %s503_s14 = sand.u32 1, %s2071_s17  }
 0x137   : > { %s502_s25 = scalar_lea.sflag [#allocation6], %s2645_s5  ;;  %s504_s12 = scalar_lea.vmem [#allocation5], %s503_s14 }
 0x138   : > { %p3096_p4 = scmp.ne.s32.totalorder %s3060_s23, 0 }
 0x13a   : > { %2022 = dma.done.wait (%p3096_p4), %s502_s25, 16  }
 0x13b   : > { %2024 = vsyncadd (%p3096_p4), %s502_s25, 4294967280  ;;  %s3097_s6 = sld [smem:[#allocation30_spill]]  ;;  %p3098_p8 = scmp.ne.s32.totalorder %s3087_s28, 0 }
 0x141   : > { %s511_s7 = sand.u32 1, %s3097_s6  }
 0x142   : > { %s2654_s24 = sshll.u32 %s511_s7, 3 }
 0x143   : > { %s513_s22 = scalar_lea.vmem [#allocation7], %s2654_s24 }
 0x144   : > { %2026 = dma.done.wait (%p3098_p8), %s502_s25, 128  }
 0x145   : > { %2028 = vsyncadd (%p3098_p8), %s502_s25, 4294967168  ;;  %s519_s2 = scalar_lea.sflag [#allocation9], %s2645_s5  ;;  %s522_s9 = scalar_lea.vmem [#allocation8], %s2654_s24 }
 0x146   : > { %2030 = dma.done.wait (%p3098_p8), %s519_s2, 128  }
 0x147   : > { %2032 = vsyncadd (%p3098_p8), %s519_s2, 4294967168  ;;  %p3099_p6 = scmp.eq.s32.totalorder %s2277_s27, 0 }
 0x149   : > { %2034 = dma.done.wait (%p3099_p6), [#allocation9], 256   ;;  %p3100_p12 = pmov %p3099_p6 }
 0x14a   : > { %p3101_p2 = pmov %p3099_p6 }
 0x14b   : > { %2036 = vsyncadd (%p3100_p12), [#allocation9], 4294967040 }
 0x14c   : > { %2038 = dma.done.wait (%p3101_p2), [#allocation12], 32   ;;  %p3102_p10 = pmov %p3101_p2 }
 0x14d   : > { %p3103_p13 = pmov %p3101_p2 }
 0x14e   : > { %2040 = vsyncadd (%p3102_p10), [#allocation12], 4294967264 }
 0x14f   : > { %2042 = dma.done.wait (%p3103_p13), [#allocation15], 16   ;;  %p3104_p7 = pmov %p3101_p2 }
 0x150   : > { %vm606_vm0 = vcmask 261120   ;;  %v603_v0 = vld [vmem:[%s496_s16] sm:$0xf]  ;;  %s2119_s23 = smov 96   ;;  %v1625_v9 = vld [vmem:[#allocation10] sm:$0xff]   ;;  %v2120_v10 = vmov 0.0  }
 0x151   : > { %2044 = vsyncadd (%p3104_p7), [#allocation15], 4294967280  ;;  %v604_v1 = vunpack.c.l.bf16 %v603_v0  ;;  %v1362_v3 = vld [vmem:[%s504_s12] ss:$0 sm:$0xff]  ;;  %1394 = vmatprep.subr.bf16.mxu0 %v2120_v10  ;;  %v1626_v11 = vld [vmem:[#allocation10 + $0x8] sm:$0xff]   ;;  %vm2121_vm1 = vmmov 0  }
 0x152   : > { %628 = vrot.lane.b32.xlu1 %v1362_v3, %s2119_s23  ;;  %1395 = vmatpush3.bf16.msra.mxu0 %v1625_v9  ;;  %v2683_v21 = vld [vmem:[#allocation14] ss:$0 sm:$0xff]  ;;  %s2122_s27 = smov 8   ;;  %v1363_v22 = vld [vmem:[#allocation11] ss:$0 sm:$0xff]  ;;  %s2123_s28 = smov 104  }
 0x153   : > { %v607_v2 = vsel %vm606_vm0, %v604_v1, 0.0  ;;  %1396 = vmatprep.subr.bf16.mxu0 %v2120_v10  ;;  %1398 = vmatprep.mubr.msk.bf16.mxu0 %vm2121_vm1, %v2120_v10  ;;  %s2124_s8 = smov 120   ;;  %s2125_s4 = smov 80   ;;  %v1367_v29 = vld [vmem:[#allocation13] ss:$0 sm:$0xff]  ;;  %vm704_vm2 = vcmask 64512  }
 0x154   : > { %608 = vadd.xlane.f32.xlu0 %v607_v2  ;;  %s2126_s29 = smov 56   ;;  %s2127_s13 = smov 48   ;;  %vm756_vm3 = vcmask 60416   ;;  %vm752_vm4 = vcmask 31744  }
 0x155   : > { %s2128_s3 = smov 72   ;;  %s2129_s16 = smov 32  }
 0x156   : > { %1397 = vmatpush3.bf16.msra.mxu0 %v1626_v11  ;;  %736 = vrot.lane.b32.xlu1 %v2683_v21, %s2122_s27  ;;  %s2130_s14 = smov 24   ;;  %s2131_s25 = smov 112  }
 0x157   : > { %s2713_s12 = sshll.u32 %s2636_s0, 4  ;;  %s3026_s7 = smov 64  }
 0x158   : > { %s2717_s6 = scalar_lea.vmem [#allocation19], %s2713_s12  ;;  %s2133_s2 = smov 88  }
 0x159   : > { %s3028_s27 = smov 4   ;;  %s2777_s24 = scalar_lea.vmem [#allocation16], %s2713_s12 }
 0x15a   : > { %s1001_s30 = scalar_lea.sflag [#allocation4], %s2636_s0 }
 0x1c4   : > { %v629_v17 = vpop.permute.xlu1 %628 }
 0x1c8   : > { %v2704_v32 = vpop.permute.xlu1 %736 }
 0x1e1   : > { %v609_v4 = vpop.xlane.xlu0 %608 }
 0x1e2   : > { %v611_v5 = vmul.f32 0.03125, %v609_v4 }
 0x1e4   : > { %v612_v6 = vsub.f32 %v604_v1, %v611_v5 }
 0x1e6   : > { %v613_v7 = vmul.f32 %v612_v6, %v612_v6 }
 0x1e8   : > { %v614_v8 = vsel %vm606_vm0, %v613_v7, 0.0 }
 0x1e9   : > { %615 = vadd.xlane.f32.xlu0 %v614_v8 }
 0x276   : > { %v616_v12 = vpop.xlane.xlu0 %615 }
 0x277   : > { %v617_v13 = vmul.f32 0.03125, %v616_v12 }
 0x279   : > { %v618_v14 = vadd.f32 1e-06, %v617_v13 }
 0x27b   : > { %1627 = vrsqrt.f32 %v618_v14 }
 0x285   : > { %v1628_v15 = vpop.eup %1627 }
 0x286   : > { %v620_v16 = vmul.f32 %v1628_v15, %v612_v6 }
 0x288   : > { %v627_v18 = vmul.f32 %v1362_v3, %v620_v16 }
 0x28a   : > { %v631_v19 = vadd.f32 %v629_v17, %v627_v18 }
 0x28c   : > { %v632_v20 = vpack.c.bf16 %v631_v19, %v631_v19 }
 0x28e   : > { %1399 = vmatmul.mubr.msk.bf16.vlgmr.msra.gmra.mrb[0].mxu0 %vm606_vm0, %v632_v20 }
 0x361   : > { %v693_v23 = vpop.f32.mrb[0].mxu0 }
 0x362   : > { %v2686_v24 = vadd.f32 %v1363_v22, %v693_v23  ;;  %v1400_v25 = vpop.f32.mrb[1].mxu0 }
 0x363   : > { %v696_v26 = vpop.f32.mrb[2].mxu0 }
 0x364   : > { %v1401_v27 = vpop.f32.mrb[3].mxu0  ;;  %v703_v28 = vmul.f32 %v2686_v24, %v2686_v24  ;;  %v2700_v30 = vpack.c.bf16 %v2686_v24, %v2686_v24 }
 0x366   : > { %784 = vrot.lane.b32.xlu1 %v703_v28, %s2123_s28  ;;  %721 = vrot.lane.b32.xlu0 %v703_v28, %s2124_s8  ;;  %v705_v31 = vsel %vm704_vm2, %v703_v28, 0.0 }
 0x36a   : > { %856 = vrot.lane.b32.xlu1 %v703_v28, %s2125_s4  ;;  %798 = vrot.lane.b32.xlu0 %v703_v28, %s2119_s23 }
 0x36e   : > { %928 = vrot.lane.b32.xlu1 %v703_v28, %s2126_s29  ;;  %942 = vrot.lane.b32.xlu0 %v703_v28, %s2127_s13 }
 0x372   : > { %870 = vrot.lane.b32.xlu1 %v703_v28, %s2128_s3  ;;  %808 = vrot.lane.b32.xlu0 %v2683_v21, %s2129_s16  ;;  %s2135_s16 = smov 124  }
 0x376   : > { %794 = vrot.lane.b32.xlu1 %v1367_v29, %s2130_s14  ;;  %s2136_s14 = smov 100  }
 0x37a   : > { %780 = vrot.lane.b32.xlu1 %v2700_v30, %s2131_s25  ;;  %s2137_s25 = smov 116  }
 0x39e   : > { %706 = vadd.xlane.f32.xlu1 %v705_v31 }
 0x3d8   : > { %v785_v33 = vpop.permute.xlu1 %784  ;;  %v722_v34 = vpop.permute.xlu0 %721 }
 0x3d9   : > { %v724_v35 = vsel %vm704_vm2, %v722_v34, 0.0  ;;  %v787_v38 = vsel %vm704_vm2, %v785_v33, 0.0 }
 0x3da   : > { %725 = vadd.xlane.f32.xlu0 %v724_v35 }
 0x3dc   : > { %v857_v36 = vpop.permute.xlu1 %856  ;;  %v799_v37 = vpop.permute.xlu0 %798 }
 0x3dd   : > { %v801_v39 = vsel %vm704_vm2, %v799_v37, 0.0  ;;  %v859_v43 = vsel %vm704_vm2, %v857_v36, 0.0 }
 0x3de   : > { %788 = vadd.xlane.f32.xlu0 %v787_v38  ;;  %802 = vadd.xlane.f32.xlu1 %v801_v39 }
 0x3e0   : > { %v929_v40 = vpop.permute.xlu1 %928  ;;  %v943_v41 = vpop.permute.xlu0 %942 }
 0x3e1   : > { %v945_v42 = vsel %vm704_vm2, %v943_v41, 0.0  ;;  %v931_v45 = vsel %vm704_vm2, %v929_v40, 0.0 }
 0x3e2   : > { %946 = vadd.xlane.f32.xlu0 %v945_v42  ;;  %860 = vadd.xlane.f32.xlu1 %v859_v43  ;;  %v2768_v42 = vld [vmem:[%s522_s9] sm:$0xff]  ;;  %s3105_s9 = sld [smem:[#allocation35_spill]] }
 0x3e4   : > { %v871_v44 = vpop.permute.xlu1 %870  ;;  %v2737_v55 = vpop.permute.xlu0 %808 }
 0x3e5   : > { %v873_v47 = vsel %vm704_vm2, %v871_v44, 0.0 }
 0x3e6   : > { %932 = vadd.xlane.f32.xlu1 %v931_v45 }
 0x3e8   : > { %v795_v46 = vpop.permute.xlu1 %794 }
 0x3ea   : > { %874 = vadd.xlane.f32.xlu1 %v873_v47 }
 0x3ec   : > { %v781_v48 = vpop.permute.xlu1 %780 }
 0x3ed   : > { %783 = vst.msk [vmem:[%s2717_s6] sm:$0xf] %vm756_vm3, %v781_v48 }
 0x3f8   : > { %923 = vrot.lane.b32.xlu0 %v2700_v30, %s3026_s7 }
 0x3fb   : > { %866 = vrot.lane.b32.xlu1 %v1367_v29, %s2127_s13 }
 0x3ff   : > { %938 = vrot.lane.b32.xlu1 %v1367_v29, %s2128_s3 }
 0x403   : > { %880 = vrot.lane.b32.xlu1 %v2683_v21, %s2126_s29 }
 0x407   : > { %952 = vrot.lane.b32.xlu1 %v2683_v21, %s2125_s4 }
 0x40b   : > { %851 = vrot.lane.b32.xlu1 %v2700_v30, %s2133_s2  ;;  %s2139_s2 = smov 108  }
 0x42b   : > { %v707_v49 = vpop.xlane.xlu1 %706 }
 0x42c   : > { %v709_v50 = vmul.f32 0.125, %v707_v49 }
 0x42e   : > { %v710_v51 = vadd.f32 1e-06, %v709_v50 }
 0x430   : > { %1629 = vrsqrt.f32 %v710_v51 }
 0x43a   : > { %v1630_v52 = vpop.eup %1629 }
 0x43b   : > { %v712_v53 = vmul.f32 %v1630_v52, %v2686_v24 }
 0x43d   : > { %v2731_v54 = vmul.f32 %v1367_v29, %v712_v53 }
 0x43f   : > { %747 = vrot.lane.b32.xlu0 %v2731_v54, %s3028_s27  ;;  %742 = vrot.lane.b32.xlu1 %v2731_v54, %s2135_s16 }
 0x467   : > { %v726_v56 = vpop.xlane.xlu0 %725 }
 0x468   : > { %v727_v57 = vmul.f32 0.125, %v726_v56 }
 0x46a   : > { %v728_v58 = vadd.f32 1e-06, %v727_v57 }
 0x46b   : > { %v789_v59 = vpop.xlane.xlu0 %788  ;;  %v803_v60 = vpop.xlane.xlu1 %802 }
 0x46c   : > { %1631 = vrsqrt.f32 %v728_v58  ;;  %v790_v61 = vmul.f32 0.125, %v789_v59  ;;  %v804_v3 = vmul.f32 0.125, %v803_v60 }
 0x46e   : > { %v791_v62 = vadd.f32 1e-06, %v790_v61  ;;  %v805_v8 = vadd.f32 1e-06, %v804_v3 }
 0x46f   : > { %v947_v63 = vpop.xlane.xlu0 %946  ;;  %v861_v0 = vpop.xlane.xlu1 %860 }
 0x470   : > { %1633 = vrsqrt.f32 %v791_v62  ;;  %v862_v1 = vmul.f32 0.125, %v861_v0  ;;  %v948_v16 = vmul.f32 0.125, %v947_v63 }
 0x472   : > { %v863_v2 = vadd.f32 1e-06, %v862_v1  ;;  %v949_v21 = vadd.f32 1e-06, %v948_v16 }
 0x473   : > { %v924_v4 = vpop.permute.xlu0 %923  ;;  %v933_v5 = vpop.xlane.xlu1 %932 }
 0x474   : > { %1375 = vst.msk [vmem:[%s2717_s6 + $0x8] sm:$0xf] %vm756_vm3, %v924_v4  ;;  %1635 = vrsqrt.f32 %v863_v2  ;;  %v934_v6 = vmul.f32 0.125, %v933_v5 }
 0x475   : > { %1637 = vrsqrt.f32 %v805_v8 }
 0x476   : > { %v1632_v7 = vpop.eup %1631  ;;  %v935_v12 = vadd.f32 1e-06, %v934_v6 }
 0x477   : > { %v875_v9 = vpop.xlane.xlu1 %874  ;;  %v730_v10 = vmul.f32 %v1632_v7, %v2686_v24 }
 0x478   : > { %v876_v11 = vmul.f32 0.125, %v875_v9 }
 0x479   : > { %v739_v13 = vmul.f32 %v2704_v32, %v730_v10 }
 0x47a   : > { %v1634_v14 = vpop.eup %1633  ;;  %v877_v15 = vadd.f32 1e-06, %v876_v11 }
 0x47b   : > { %759 = vrot.lane.b32.xlu1 %v739_v13, %s2124_s8  ;;  %v867_v17 = vpop.permute.xlu1 %866  ;;  %v793_v18 = vmul.f32 %v1634_v14, %v2686_v24  ;;  %s2138_s8 = smov 84  }
 0x47c   : > { %1639 = vrsqrt.f32 %v877_v15 }
 0x47d   : > { %1641 = vrsqrt.f32 %v935_v12  ;;  %v797_v19 = vmul.f32 %v795_v46, %v793_v18 }
 0x47e   : > { %v1636_v20 = vpop.eup %1635  ;;  %1643 = vrsqrt.f32 %v949_v21 }
 0x47f   : > { %817 = vrot.lane.b32.xlu0 %v797_v19, %s2136_s14  ;;  %763 = vrot.lane.b32.xlu1 %v739_v13, %s2137_s25  ;;  %v939_v22 = vpop.permute.xlu1 %938  ;;  %v865_v23 = vmul.f32 %v1636_v20, %v2686_v24  ;;  %v1638_v27 = vpop.eup %1637  ;;  %s2143_s25 = smov 76  }
 0x480   : > { %v807_v34 = vmul.f32 %v1638_v27, %v2686_v24 }
 0x481   : > { %v869_v25 = vmul.f32 %v867_v17, %v865_v23 }
 0x482   : > { %v811_v38 = vmul.f32 %v2737_v55, %v807_v34 }
 0x483   : > { %768 = vrot.lane.b32.xlu1 %v739_v13, %s2135_s16  ;;  %v881_v26 = vpop.permute.xlu1 %880  ;;  %885 = vrot.lane.b32.xlu0 %v869_v25, %s2125_s4  ;;  %s2140_s4 = smov 68   ;;  %s2142_s16 = smov 92  }
 0x486   : > { %v1640_v28 = vpop.eup %1639 }
 0x487   : > { %v1642_v29 = vpop.eup %1641  ;;  %v879_v31 = vmul.f32 %v1640_v28, %v2686_v24  ;;  %813 = vrot.lane.b32.xlu1 %v797_v19, %s2123_s28  ;;  %v953_v32 = vpop.permute.xlu1 %952  ;;  %894 = vrot.lane.b32.xlu0 %v869_v25, %s2138_s8  ;;  %s2141_s28 = smov 52   ;;  %s2145_s8 = smov 44  }
 0x488   : > { %v937_v35 = vmul.f32 %v1642_v29, %v2686_v24  ;;  %v1644_v37 = vpop.eup %1643 }
 0x489   : > { %v883_v33 = vmul.f32 %v881_v26, %v879_v31  ;;  %v951_v40 = vmul.f32 %v1644_v37, %v2686_v24  ;;  %v2764_v24 = vld [vmem:[%s513_s22] sm:$0xff]  ;;  %s2787_s22 = scalar_lea.vmem [#allocation17], %s2713_s12 }
 0x48a   : > { %v941_v39 = vmul.f32 %v939_v22, %v937_v35  ;;  %v740_v45 = vmul.f32 %v2731_v54, %v2764_v24 }
 0x48b   : > { %822 = vrot.lane.b32.xlu1 %v797_v19, %s2139_s2  ;;  %v852_v36 = vpop.permute.xlu1 %851  ;;  %909 = vrot.lane.b32.xlu0 %v883_v33, %s2140_s4  ;;  %v955_v41 = vmul.f32 %v953_v32, %v951_v40  ;;  %s1048_s2 = sshll.u32 %s2787_s22, 4  ;;  %s2828_s2 = int_to_ptr.vmem [resolvable:$true] %s1048_s2 }
 0x48c   : > { %1372 = vst.msk [vmem:[%s2717_s6 + $0x4] sm:$0xf] %vm756_vm3, %v852_v36 }
 0x48f   : > { %833 = vrot.lane.b32.xlu1 %v811_v38, %s2119_s23  ;;  %961 = vrot.lane.b32.xlu0 %v941_v39, %s2141_s28  ;;  %s2144_s23 = smov 60  }
 0x493   : > { %837 = vrot.lane.b32.xlu1 %v811_v38, %s2142_s16  ;;  %977 = vrot.lane.b32.xlu0 %v955_v41, %s2127_s13  ;;  %s3106_s13 = sld [smem:[#allocation34_spill]]  ;;  %s3107_s16 = sld [smem:[#allocation40_spill]] }
 0x497   : > { %842 = vrot.lane.b32.xlu1 %v811_v38, %s2136_s14  ;;  %986 = vrot.lane.b32.xlu0 %v955_v41, %s2141_s28  ;;  %s1028_s14 = sshll.u32 %s2777_s24, 4  ;;  %s1068_s28 = sshll.u32 %s2717_s6, 4  ;;  %s2825_s14 = int_to_ptr.vmem [resolvable:$true] %s1028_s14  ;;  %s2835_s28 = int_to_ptr.vmem [resolvable:$true] %s1068_s28 }
 0x498   : > { %s1877_s21 = scalar_lea.vmem %s2825_s14, 256 }
 0x499   : > { %p1878_p5 = scmp.ne.s32.totalorder %s2825_s14, %s1877_s21  ;;  %p3112_p1 = scmp.ne.s32.totalorder %s3107_s16, 0 }
 0x49b   : > { %889 = vrot.lane.b32.xlu1 %v869_v25, %s2143_s25  ;;  %p1879_p0 = pnand %p1878_p5, %p3112_p1 }
 0x49d   : > { %p1880_p3 = pneg %p1879_p0 }
 0x49f   : > { %905 = vrot.lane.b32.xlu1 %v883_v33, %s2128_s3  ;;  %s1382_s3 = sshll.u32 %s3105_s9, 3 }
 0x4a0   : > { %s1025_s12 = sadd.s32 %s3106_s13, %s1382_s3  ;;  %s3109_s3 = sld [smem:[#allocation52_spill]] }
 0x4a1   : > { %s1383_s4 = sshll.u32 %s1025_s12, 6 }
 0x4a3   : > { %914 = vrot.lane.b32.xlu1 %v883_v33, %s2143_s25  ;;  %s3110_s25 = sld [smem:[#allocation53_spill]] }
 0x4a6   : > { %s2845_s12 = scalar_lea.hbm %s3109_s3, %s1383_s4 }
 0x4a7   : > { %957 = vrot.lane.b32.xlu1 %v941_v39, %s2126_s29  ;;  %s2146_s29 = smov 40  }
 0x4a9   : > { %s3111_s11 = smov %s3110_s25 }
 0x4ab   : > { %966 = vrot.lane.b32.xlu1 %v941_v39, %s2144_s23  ;;  %s2850_s23 = scalar_lea.hbm %s3110_s25, %s1383_s4 }
 0x4af   : > { %981 = vrot.lane.b32.xlu1 %v955_v41, %s2145_s8  ;;  %s3108_s8 = sld [smem:[#allocation51_spill]] }
 0x4b1   : > { %v748_v43 = vpop.permute.xlu0 %747  ;;  %v743_v44 = vpop.permute.xlu1 %742 }
 0x4b2   : > { %v750_v46 = vmul.f32 %v748_v43, %v2768_v42  ;;  %v745_v47 = vmul.f32 %v743_v44, %v2768_v42 }
 0x4b3   : > { %995 = vrot.lane.b32.xlu1 %v2700_v30, %s2146_s29 }
 0x4b4   : > { %v751_v48 = vadd.f32 %v750_v46, %v740_v45  ;;  %v746_v49 = vadd.f32 %v745_v47, %v740_v45 }
 0x4b5   : > { %s2833_s29 = scalar_lea.hbm %s3108_s8, %s1383_s4 }
 0x4b6   : > { %v753_v50 = vsel %vm752_vm4, %v746_v49, %v751_v48 }
 0x4b7   : > { %v754_v51 = vmul.f32 0.35355338, %v753_v50 }
 0x4b9   : > { %v755_v52 = vpack.c.bf16 %v754_v51, %v754_v51 }
 0x4bb   : > { %757 = vst.msk [vmem:[%s2777_s24] sm:$0xf] %vm756_vm3, %v755_v52 }
 0x4ed   : > { %v760_v53 = vpop.permute.xlu1 %759 }
 0x4ee   : > { %v762_v57 = vmul.f32 %v760_v53, %v2764_v24 }
 0x4f1   : > { %v764_v54 = vpop.permute.xlu1 %763  ;;  %v818_v60 = vpop.permute.xlu0 %817 }
 0x4f2   : > { %v766_v55 = vmul.f32 %v764_v54, %v2768_v42  ;;  %v820_v2 = vmul.f32 %v818_v60, %v2768_v42 }
 0x4f4   : > { %v767_v58 = vadd.f32 %v766_v55, %v762_v57 }
 0x4f5   : > { %v769_v56 = vpop.permute.xlu1 %768  ;;  %v886_v4 = vpop.permute.xlu0 %885 }
 0x4f6   : > { %v771_v30 = vmul.f32 %v769_v56, %v2768_v42  ;;  %v888_v22 = vmul.f32 %v886_v4, %v2764_v24 }
 0x4f8   : > { %v772_v59 = vadd.f32 %v771_v30, %v762_v57 }
 0x4f9   : > { %v814_v61 = vpop.permute.xlu1 %813  ;;  %v895_v10 = vpop.permute.xlu0 %894 }
 0x4fa   : > { %v773_v62 = vsel %vm752_vm4, %v767_v58, %v772_v59  ;;  %v816_v0 = vmul.f32 %v814_v61, %v2764_v24  ;;  %v897_v18 = vmul.f32 %v895_v10, %v2768_v42 }
 0x4fb   : > { %v774_v63 = vpack.c.bf16 %v773_v62, %v773_v62 }
 0x4fc   : > { %v821_v5 = vadd.f32 %v820_v2, %v816_v0  ;;  %v898_v27 = vadd.f32 %v897_v18, %v888_v22 }
 0x4fd   : > { %775 = vst.msk [vmem:[%s2787_s22] sm:$0xf] %vm756_vm3, %v774_v63  ;;  %v823_v1 = vpop.permute.xlu1 %822  ;;  %v910_v17 = vpop.permute.xlu0 %909 }
 0x4fe   : > { %v825_v3 = vmul.f32 %v823_v1, %v2768_v42  ;;  %v912_v37 = vmul.f32 %v910_v17, %v2768_v42 }
 0x500   : > { %v826_v6 = vadd.f32 %v825_v3, %v816_v0 }
 0x501   : > { %v834_v7 = vpop.permute.xlu1 %833  ;;  %v962_v29 = vpop.permute.xlu0 %961 }
 0x502   : > { %v827_v8 = vsel %vm752_vm4, %v821_v5, %v826_v6  ;;  %v836_v15 = vmul.f32 %v834_v7, %v2764_v24  ;;  %v964_v49 = vmul.f32 %v962_v29, %v2768_v42 }
 0x503   : > { %v828_v9 = vmul.f32 0.35355338, %v827_v8 }
 0x505   : > { %v829_v11 = vpack.c.bf16 %v828_v9, %v828_v9  ;;  %v838_v12 = vpop.permute.xlu1 %837  ;;  %v978_v39 = vpop.permute.xlu0 %977 }
 0x506   : > { %v840_v13 = vmul.f32 %v838_v12, %v2768_v42  ;;  %v980_v55 = vmul.f32 %v978_v39, %v2764_v24 }
 0x507   : > { %1370 = vst.msk [vmem:[%s2777_s24 + $0x4] sm:$0xf] %vm756_vm3, %v829_v11 }
 0x508   : > { %v841_v19 = vadd.f32 %v840_v13, %v836_v15 }
 0x509   : > { %v843_v14 = vpop.permute.xlu1 %842  ;;  %v987_v47 = vpop.permute.xlu0 %986 }
 0x50a   : > { %v845_v16 = vmul.f32 %v843_v14, %v2768_v42  ;;  %v989_v51 = vmul.f32 %v987_v47, %v2768_v42 }
 0x50c   : > { %v846_v20 = vadd.f32 %v845_v16, %v836_v15  ;;  %v990_v58 = vadd.f32 %v989_v51, %v980_v55 }
 0x50d   : > { %v890_v21 = vpop.permute.xlu1 %889 }
 0x50e   : > { %v847_v23 = vsel %vm752_vm4, %v841_v19, %v846_v20  ;;  %v892_v25 = vmul.f32 %v890_v21, %v2768_v42 }
 0x50f   : > { %v848_v26 = vpack.c.bf16 %v847_v23, %v847_v23 }
 0x510   : > { %v893_v28 = vadd.f32 %v892_v25, %v888_v22 }
 0x511   : > { %1371 = vst.msk [vmem:[%s2787_s22 + $0x4] sm:$0xf] %vm756_vm3, %v848_v26  ;;  %v906_v31 = vpop.permute.xlu1 %905 }
 0x512   : > { %v899_v32 = vsel %vm752_vm4, %v893_v28, %v898_v27  ;;  %v908_v34 = vmul.f32 %v906_v31, %v2764_v24 }
 0x513   : > { %v900_v33 = vmul.f32 0.35355338, %v899_v32 }
 0x514   : > { %v913_v40 = vadd.f32 %v912_v37, %v908_v34 }
 0x515   : > { %v901_v35 = vpack.c.bf16 %v900_v33, %v900_v33  ;;  %v915_v36 = vpop.permute.xlu1 %914 }
 0x516   : > { %v917_v38 = vmul.f32 %v915_v36, %v2768_v42 }
 0x517   : > { %1373 = vst.msk [vmem:[%s2777_s24 + $0x8] sm:$0xf] %vm756_vm3, %v901_v35 }
 0x518   : > { %v918_v41 = vadd.f32 %v917_v38, %v908_v34 }
 0x519   : > { %v958_v43 = vpop.permute.xlu1 %957 }
 0x51a   : > { %v919_v44 = vsel %vm752_vm4, %v913_v40, %v918_v41  ;;  %v960_v46 = vmul.f32 %v958_v43, %v2764_v24 }
 0x51b   : > { %v920_v45 = vpack.c.bf16 %v919_v44, %v919_v44 }
 0x51c   : > { %v965_v52 = vadd.f32 %v964_v49, %v960_v46 }
 0x51d   : > { %1374 = vst.msk [vmem:[%s2787_s22 + $0x8] sm:$0xf] %vm756_vm3, %v920_v45  ;;  %v967_v48 = vpop.permute.xlu1 %966 }
 0x51e   : > { %v969_v50 = vmul.f32 %v967_v48, %v2768_v42 }
 0x520   : > { %v970_v53 = vadd.f32 %v969_v50, %v960_v46 }
 0x521   : > { %v982_v54 = vpop.permute.xlu1 %981 }
 0x522   : > { %v971_v56 = vsel %vm752_vm4, %v965_v52, %v970_v53  ;;  %v984_v57 = vmul.f32 %v982_v54, %v2768_v42 }
 0x523   : > { %v972_v30 = vmul.f32 0.35355338, %v971_v56 }
 0x524   : > { %v985_v59 = vadd.f32 %v984_v57, %v980_v55 }
 0x525   : > { %v973_v60 = vpack.c.bf16 %v972_v30, %v972_v30  ;;  %v996_v24 = vpop.permute.xlu1 %995 }
 0x526   : > { %v991_v42 = vsel %vm752_vm4, %v985_v59, %v990_v58  ;;  %1378 = vst.msk [vmem:[%s2717_s6 + $0xc] sm:$0xf] %vm756_vm3, %v996_v24  ;;  %s2147_s6 = smov [#allocation16]  }
 0x527   : > { %1376 = vst.msk [vmem:[%s2777_s24 + $0xc] sm:$0xf] %vm756_vm3, %v973_v60  ;;  %v992_v61 = vpack.c.bf16 %v991_v42, %v991_v42  ;;  %s1881_s20 = sshll.u32 %s2147_s6, 4  ;;  %s1882_s20 = int_to_ptr.vmem [resolvable:$false] %s1881_s20 }
 0x528   : > { %s1883_s24 = scalar_lea.vmem %s1882_s20, 512  ;;  %p1884_p9 = scmp.lt.s32.totalorder %s2825_s14, %s1882_s20 }
 0x529   : > { %p1885_p11 = scmp.lt.s32.totalorder %s1883_s24, %s1877_s21 }
 0x52b   : > { %p1886_p4 = por %p1885_p11, %p1884_p9 }
 0x52d   : > { %p1887_p8 = pnand %p1886_p4, %p1880_p3 }
 0x52f   : > { %1890 = shalt.err (!%p1887_p8)
}
 0x530   : > { %s1891_s7 = scalar_lea.hbm %s2833_s29, 256  ;;  %s1895_s9 = scalar_lea.hbm %s3108_s8, 1024 }
 0x531   : > { %p1892_p6 = scmp.ne.s32.totalorder %s2833_s29, %s1891_s7  ;;  %p1896_p10 = scmp.lt.u32.totalorder %s2833_s29, %s3108_s8 }
 0x532   : > { %p1897_p13 = scmp.lt.u32.totalorder %s1895_s9, %s1891_s7  ;;  %p1899_p5 = scmp.lt.u32.totalorder %s1891_s7, %s2833_s29 }
 0x533   : > { %p1893_p12 = pnand %p1892_p6, %p3112_p1 }
 0x534   : > { %p1898_p7 = por %p1897_p13, %p1896_p10 }
 0x535   : > { %p1894_p2 = pneg %p1893_p12 }
 0x536   : > { %p1900_p0 = por %p1899_p5, %p1898_p7 }
 0x538   : > { %p1901_p3 = pnand %p1900_p0, %p1894_p2 }
 0x53a   : > { %1904 = shalt.err (!%p1901_p3)
}
 0x53b   : > { %s2148_s21 = smov 128   ;;  %s3113_s25 = smov 4   ;;  %1377 = vst.msk [vmem:[%s2787_s22 + $0xc] sm:$0xf] %vm756_vm3, %v992_v61 }
 0x53c   : > { %s3114_s6 = smov 64   ;;  %s1006_s24 = scalar_lea.sflag [#allocation18], %s2645_s5 }
 0x53d   : > { %1426 = dma.vmem_to_hbm [thread:$0]  (%p3112_p1), %s2825_s14, 256, %s2833_s29, %s1001_s30, %s3114_s6, %s2148_s21, %s3113_s25  }
 0x53e   : > { %s1905_s7 = scalar_lea.vmem %s2828_s2, 256  ;;  %s2149_s27 = smov [#allocation17]  }
 0x53f   : > { %p1906_p9 = scmp.ne.s32.totalorder %s2828_s2, %s1905_s7  ;;  %s1909_s4 = sshll.u32 %s2149_s27, 4  ;;  %s1910_s4 = int_to_ptr.vmem [resolvable:$false] %s1909_s4 }
 0x540   : > { %s1911_s0 = scalar_lea.vmem %s1910_s4, 512  ;;  %p1912_p8 = scmp.lt.s32.totalorder %s2828_s2, %s1910_s4 }
 0x541   : > { %p1907_p11 = pnand %p1906_p9, %p3112_p1  ;;  %p1913_p6 = scmp.lt.s32.totalorder %s1911_s0, %s1905_s7 }
 0x543   : > { %p1908_p4 = pneg %p1907_p11  ;;  %p1914_p12 = por %p1913_p6, %p1912_p8 }
 0x545   : > { %p1915_p2 = pnand %p1914_p12, %p1908_p4 }
 0x547   : > { %1918 = shalt.err (!%p1915_p2)
}
 0x548   : > { %s1919_s30 = scalar_lea.hbm %s2845_s12, 256  ;;  %s1923_s29 = scalar_lea.hbm %s3109_s3, 1024 }
 0x549   : > { %p1920_p10 = scmp.ne.s32.totalorder %s2845_s12, %s1919_s30  ;;  %p1924_p5 = scmp.lt.u32.totalorder %s2845_s12, %s3109_s3 }
 0x54a   : > { %p1925_p0 = scmp.lt.u32.totalorder %s1923_s29, %s1919_s30  ;;  %p1927_p9 = scmp.lt.u32.totalorder %s1919_s30, %s2845_s12 }
 0x54b   : > { %p1921_p13 = pnand %p1920_p10, %p3112_p1 }
 0x54c   : > { %p1926_p3 = por %p1925_p0, %p1924_p5 }
 0x54d   : > { %p1922_p7 = pneg %p1921_p13 }
 0x54e   : > { %p1928_p11 = por %p1927_p9, %p1926_p3 }
 0x550   : > { %p1929_p4 = pnand %p1928_p11, %p1922_p7 }
 0x552   : > { %1932 = shalt.err (!%p1929_p4)
}
 0x553   : > { %1427 = dma.vmem_to_hbm [thread:$0]  (%p3112_p1), %s2828_s2, 256, %s2845_s12, %s1006_s24, %s3114_s6, %s2148_s21, %s3113_s25  }
 0x554   : > { %s1933_s20 = scalar_lea.vmem %s2835_s28, 256  ;;  %s2150_s7 = smov [#allocation19]  }
 0x555   : > { %p1934_p8 = scmp.ne.s32.totalorder %s2835_s28, %s1933_s20  ;;  %s1937_s27 = sshll.u32 %s2150_s7, 4  ;;  %s1938_s27 = int_to_ptr.vmem [resolvable:$false] %s1937_s27 }
 0x556   : > { %s1939_s4 = scalar_lea.vmem %s1938_s27, 512  ;;  %p1940_p2 = scmp.lt.s32.totalorder %s2835_s28, %s1938_s27 }
 0x557   : > { %p1935_p6 = pnand %p1934_p8, %p3112_p1  ;;  %p1941_p10 = scmp.lt.s32.totalorder %s1939_s4, %s1933_s20 }
 0x559   : > { %p1936_p12 = pneg %p1935_p6  ;;  %p1942_p13 = por %p1941_p10, %p1940_p2 }
 0x55b   : > { %p1943_p7 = pnand %p1942_p13, %p1936_p12 }
 0x55d   : > { %1946 = shalt.err (!%p1943_p7)
}
 0x55e   : > { %s1947_s2 = scalar_lea.hbm %s2850_s23, 256  ;;  %s1951_s30 = scalar_lea.hbm %s3111_s11, 1024 }
 0x55f   : > { %p1948_p5 = scmp.ne.s32.totalorder %s2850_s23, %s1947_s2  ;;  %p1952_p9 = scmp.lt.u32.totalorder %s2850_s23, %s3111_s11 }
 0x560   : > { %p1953_p11 = scmp.lt.u32.totalorder %s1951_s30, %s1947_s2  ;;  %p1955_p8 = scmp.lt.u32.totalorder %s1947_s2, %s2850_s23 }
 0x561   : > { %p1949_p0 = pnand %p1948_p5, %p3112_p1 }
 0x562   : > { %p1954_p4 = por %p1953_p11, %p1952_p9 }
 0x563   : > { %p1950_p3 = pneg %p1949_p0 }
 0x564   : > { %p1956_p6 = por %p1955_p8, %p1954_p4 }
 0x566   : > { %p1957_p12 = pnand %p1956_p6, %p1950_p3 }
 0x568   : > { %1960 = shalt.err (!%p1957_p12)
}
 0x569   : > { %1428 = dma.vmem_to_hbm [thread:$0]  (%p3112_p1), %s2835_s28, 256, %s2850_s23, %s1006_s24, %s3114_s6, %s2148_s21, %s3113_s25  }
 0x56a PF: > { %p1477_p2 = scmp.ge.s32.totalorder %s2107_s26, 2  ;;  %s1083_s29 = sand.u32 1, %s2079_s19  }
 0x56b   : > { %p3115_p10 = scmp.ne.s32.totalorder %s3075_s10, 0  ;;  %s1084_s9 = scalar_lea.sflag [#allocation4], %s1083_s29 }
 0x56d   : > { %p1459_p13 = pnand %p1477_p2, %p3115_p10 }
 0x56f   : > { %2046 = dma.done.wait (!%p1459_p13), %s1084_s9, 256  }
 0x570   : > { %2048 = vsyncadd (!%p1459_p13), %s1084_s9, 4294967040  ;;  %s3116_s16 = sadd.s32 4294967294, %s2107_s26  }
 0x571   : > { %s1092_s13 = sand.u32 1, %s3116_s16  }
 0x572   : > { %s1093_s20 = scalar_lea.sflag [#allocation18], %s1092_s13 }
 0x573   : > { %2050 = dma.done.wait (!%p1459_p13), %s1093_s20, 512  }
 0x574   : > { %2052 = vsyncadd (!%p1459_p13), %s1093_s20, 4294966784  ;;  %s38_s26 = sadd.s32 1, %s2107_s26   ;;  %s3118_s13 = sld [smem:[#allocation30_spill]] }
 0x575   : > { %p2941_p1 = scmp.ge.s32.totalorder %s38_s26, 6   ;;  %s3119_s14 = sld [smem:[#allocation31_spill]] }
 0x576   : > { %s3120_s19 = smov %s2497_s15  ;;  %s3121_s10 = sld [smem:[#allocation32_spill]] }
 0x577   : > { %s3122_s20 = sld [smem:[#allocation33_spill]]  ;;  %s3123_s21 = sld [smem:[#allocation42_spill]] }
 0x578   : > { %s3124_s22 = sld [smem:[#allocation36_spill]]  ;;  %s3125_s23 = sld [smem:[#allocation37_spill]] }
 0x579   : > { %s3126_s24 = sld [smem:[#allocation39_spill]]  ;;  %s3127_s25 = sld [smem:[#allocation41_spill]] }
 0x57a   : > { %s3128_s15 = smov %s2550_s1  ;;  %s3129_s16 = smov %s2071_s17 }
 0x57b   : > { %s3130_s17 = smov %s2075_s18  ;;  %s3131_s18 = smov %s3120_s19 }
 0x57c   : > { %s3132_s19 = smov %s3121_s10  ;;  %37 = sbr.rel (!%p2941_p1) target bundleno = 30 (0x1e), region = 193 }
 0x583   :  { %1107 = vsyncpa [#allocation3], 1 }
 0x584   :  { %1109 = vsyncpa [#allocation3 + $0x1], 1 }
 0x585   :  { %1110 = vsyncpa [#allocation6], 1 }
 0x586   :  { %1112 = vsyncpa [#allocation6 + $0x1], 1 }
 0x587   :  { %1113 = vsyncpa [#allocation9], 1 }
 0x588   :  { %1115 = vsyncpa [#allocation9 + $0x1], 1 }
 0x589   :  { %1116 = vsyncpa [#allocation12], 1 }
 0x58a   :  { %1117 = vsyncpa [#allocation15], 1 }
 0x58b   :  { %1118 = vsyncpa [#allocation4], 1 }
 0x58c   :  { %1120 = vsyncpa [#allocation4 + $0x1], 1 }
 0x58d   :  { %1121 = vsyncpa [#allocation18], 1 }
 0x58e   :  { %1123 = vsyncpa [#allocation18 + $0x1], 1 }

</bundles_post_ra>
